<compile_context>
chip_gen: v5e
topology: v5e:2x2
jax: 0.10.0
libtpu: 0.0.40
codegen_flags: <defaults>
</compile_context>

<pallas_src>
import functools

import jax
import jax.numpy as jnp
import numpy as np
from jax.experimental import pallas as pl
from jax.experimental.pallas import tpu as pltpu


def _round_up(x, m):
    return ((x + m - 1) // m) * m


def _pixel_effect_kernel(rgb_ref, out_ref, *, num_bins):
    # rgb_ref: (3, KK, TP) bf16 -- patch pixels on sublanes (KK = k*k), patch index on lanes.
    # out_ref: (3, TP) f32      -- dominant-bin mean color per patch, lane-dense.
    f32 = jnp.float32

    # intensity bins with constants folded: floor(((r+g+b)/3) / (256/num_bins))
    #                                     = floor((r+g+b) * num_bins/768)
    # channels are upcast per use; no (3, KK, TP) f32 temporary is kept live.
    chan_sum = (rgb_ref[0].astype(f32) + rgb_ref[1].astype(f32) + rgb_ref[2].astype(f32))
    bins = jnp.floor(chan_sum * (num_bins / 768.0))          # (KK, TP)
    bins = jnp.minimum(bins, float(num_bins - 1))            # guard (inputs are in [0, 255])

    # per-patch histogram over KK (sublane axis) + argmax (first-occurrence tie-break)
    best_count = jnp.sum((bins == 0.0).astype(f32), axis=0, keepdims=True)   # (1, TP)
    best_bin = jnp.zeros_like(best_count)
    for bv in range(1, num_bins):
        cnt = jnp.sum((bins == float(bv)).astype(f32), axis=0, keepdims=True)
        better = cnt > best_count
        best_bin = jnp.where(better, float(bv), best_bin)
        best_count = jnp.where(better, cnt, best_count)

    mask = (bins == best_bin).astype(f32)                    # (KK, TP)
    # sum(mask) == best_count (no extra reduction); max(.,1) only matters for all-zero
    # padded tail patches which the wrapper slices off anyway. EUP slot -> nearly free.
    inv_count = pl.reciprocal(jnp.maximum(best_count, 1.0), approx=True)     # (1, TP)

    for c in range(3):                                       # mean RGB over dominant-bin pixels
        ch = rgb_ref[c].astype(f32)                          # re-read bf16 input, upcast per use
        s = jnp.sum(ch * mask, axis=0, keepdims=True)        # (1, TP)
        out_ref[c:c + 1, :] = s * inv_count                  # lane-dense row store


def _extract_patches(x, k, s):
    """x: [B, C, Hp, Wp] -> ([C, k*k, B*nH*nW], nH, nW)  (F.unfold, emitted in kernel layout)."""
    B, C, H, W = x.shape
    nH = (H - k) // s + 1
    nW = (W - k) // s + 1
    row_idx = (jnp.arange(nH) * s)[:, None] + jnp.arange(k)[None, :]    # (nH, k)
    col_idx = (jnp.arange(nW) * s)[:, None] + jnp.arange(k)[None, :]    # (nW, k)
    xr = x[:, :, row_idx, :]                   # (B, C, nH, k, W)
    xp = xr[:, :, :, :, col_idx]               # (B, C, nH, k, nW, k)
    # channel-major / patch-last so the reshape lands directly in the (C, KK, P) kernel layout;
    # XLA fuses the permute into the gather that already materializes the patch tensor.
    xp = jnp.transpose(xp, (1, 3, 5, 0, 2, 4))               # (C, kr, kc, B, nH, nW)
    return xp.reshape(C, k * k, B * nH * nW), nH, nW


def photo2pixel_forward(rgb, param_kernel_size=20, param_pixel_size=16,
                        param_with_padding=1, param_num_bins=4, tile_patches=1024):
    """rgb: [B, 3, H, W] float in [0, 255] (NCHW, like the PyTorch module). Returns NCHW f32."""
    B, C, H, W = rgb.shape
    assert C == 3, "Photo2PixelModel expects RGB input"
    k, s = param_kernel_size, param_pixel_size

    # Ship patches as bf16 (exact for 8-bit pixel values 0..255) to halve HBM traffic;
    # all histogram / accumulation math stays in f32 inside the kernel.
    rgb = rgb.astype(jnp.bfloat16)

    # TODO(synk): PixelEffectModule source was not included in the prompt; the pad amount
    # (pixel_size // 2, reflect) and bin rule floor(intensity / (256 / num_bins)) follow the
    # reference photo2pixel implementation.
    if param_with_padding == 1:
        pad = param_pixel_size // 2
        rgb = jnp.pad(rgb, ((0, 0), (0, 0), (pad, pad), (pad, pad)), mode="reflect")

    # TODO(synk): overlapping patch extraction is still XLA-side glue; a manual-DMA kernel
    # streaming kernel_size-row bands of the padded image (memory_space=pl.ANY) would remove
    # this duplicated-patch HBM round trip entirely.
    rgb_p, nH, nW = _extract_patches(rgb, k, s)              # (3, KK, P) bf16
    KK = k * k
    P = B * nH * nW

    # Lane tile: multiple of 128. Clamp so the grid has >= 2 steps whenever P allows it
    # (megacore sharding on v7x); large inputs still get the full tile_patches width.
    P128 = _round_up(P, 128)
    TP = max(128, min(tile_patches, 128 * (P128 // 256)))
    P_pad = _round_up(P, TP)
    nT = P_pad // TP
    if P_pad != P:
        rgb_p = jnp.pad(rgb_p, ((0, 0), (0, 0), (0, P_pad - P)))

    # Pre-tile so each grid block is one contiguous HBM slab -> a single linear DMA per block.
    rgb_t = jnp.moveaxis(rgb_p.reshape(3, KK, nT, TP), 2, 0)  # (nT, 3, KK, TP)

    kernel = functools.partial(_pixel_effect_kernel, num_bins=param_num_bins)
    colors = pl.pallas_call(
        kernel,
        out_shape=jax.ShapeDtypeStruct((3, P_pad), jnp.float32),
        grid_spec=pltpu.PrefetchScalarGridSpec(
            num_scalar_prefetch=0,
            grid=(nT,),
            in_specs=[pl.BlockSpec((None, 3, KK, TP), lambda i: (i, 0, 0, 0))],
            out_specs=pl.BlockSpec((3, TP), lambda i: (0, i)),
        ),
        compiler_params=pltpu.CompilerParams(
            dimension_semantics=("parallel",),
            vmem_limit_bytes=32 * 1024 * 1024,
        ),
    )(rgb_t)                                                  # (3, P_pad) f32

    # glue: tile each patch color into a pixel_size x pixel_size block, emitting NCHW directly
    # (only the tiny (3, B, nH, nW) color tensor is transposed; no full-image HBM permute).
    colors = colors[:, :P].reshape(3, B, nH, nW)
    colors = jnp.transpose(colors, (1, 0, 2, 3))              # (B, 3, nH, nW)
    out = jnp.broadcast_to(colors[:, :, :, None, :, None], (B, 3, nH, s, nW, s))
    return out.reshape(B, 3, nH * s, nW * s)


def _reference(x, num_bins=4, k=20, s=16, with_padding=1):
    """Pure-numpy float64 reference of the pixel effect (for the sanity check)."""
    x = np.asarray(x, dtype=np.float64)
    B, C, _, _ = x.shape
    if with_padding == 1:
        p = s // 2
        x = np.pad(x, ((0, 0), (0, 0), (p, p), (p, p)), mode="reflect")
    Hp, Wp = x.shape[2], x.shape[3]
    nH = (Hp - k) // s + 1
    nW = (Wp - k) // s + 1
    out = np.zeros((B, C, nH * s, nW * s), dtype=np.float64)
    for b in range(B):
        for i in range(nH):
            for j in range(nW):
                patch = x[b, :, i * s:i * s + k, j * s:j * s + k].reshape(C, -1)
                inten = patch.mean(axis=0)
                bins = np.clip(np.floor(inten / (256.0 / num_bins)), 0, num_bins - 1)
                counts = np.array([(bins == v).sum() for v in range(num_bins)])
                best = counts.argmax()
                m = bins == best
                color = patch[:, m].mean(axis=1)
                out[b, :, i * s:(i + 1) * s, j * s:(j + 1) * s] = color[:, None, None]
    return out


if __name__ == "__main__":
    key = jax.random.PRNGKey(0)
    # small NCHW RGB image batch with 8-bit pixel values in [0, 255]
    x = jax.random.randint(key, (2, 3, 64, 64), 0, 256).astype(jnp.float32)

    fwd = jax.jit(photo2pixel_forward)        # defaults: kernel_size=20, pixel_size=16, padding=1
    out = jax.block_until_ready(fwd(x))

    assert out.shape == (2, 3, 64, 64), out.shape
    assert bool(jnp.all(jnp.isfinite(out)))
    ref = _reference(np.asarray(x))
    np.testing.assert_allclose(np.asarray(out), ref, rtol=0.0, atol=1.0)
    print("KERNEL_OK")
</pallas_src>

<mosaic_0001>
module attributes {stable_mosaic.version = 11 : i64} {
  func.func @_pixel_effect_kernel(%arg0: i32, %arg1: memref<1x3x400x128xbf16, #tpu.memory_space<vmem>>, %arg2: memref<3x128xf32, #tpu.memory_space<vmem>>) attributes {dimension_semantics = [#tpu.dimension_semantics<parallel>], iteration_bounds = array<i64: 1>, scalar_prefetch = 0 : i64, scratch_operands = 0 : i64, tpu.core_type = #tpu.core_type<tc>, window_params = [{transform_indices = @transform_0, window_bounds = array<i64: 1, 3, 400, 128>}, {transform_indices = @transform_1, window_bounds = array<i64: 3, 128>}]} {
    %c0 = arith.constant 0 : index
    %c0_0 = arith.constant 0 : index
    %c0_1 = arith.constant 0 : index
    %c0_2 = arith.constant 0 : index
    %0 = vector.load %arg1[%c0, %c0_0, %c0_1, %c0_2] : memref<1x3x400x128xbf16, #tpu.memory_space<vmem>>, vector<1x1x400x128xbf16>
    %1 = vector.shape_cast %0 : vector<1x1x400x128xbf16> to vector<400x128xbf16>
    %2 = arith.extf %1 : vector<400x128xbf16> to vector<400x128xf32>
    %c0_3 = arith.constant 0 : index
    %c1 = arith.constant 1 : index
    %c0_4 = arith.constant 0 : index
    %c0_5 = arith.constant 0 : index
    %3 = vector.load %arg1[%c0_3, %c1, %c0_4, %c0_5] : memref<1x3x400x128xbf16, #tpu.memory_space<vmem>>, vector<1x1x400x128xbf16>
    %4 = vector.shape_cast %3 : vector<1x1x400x128xbf16> to vector<400x128xbf16>
    %5 = arith.extf %4 : vector<400x128xbf16> to vector<400x128xf32>
    %6 = arith.addf %2, %5 : vector<400x128xf32>
    %c0_6 = arith.constant 0 : index
    %c2 = arith.constant 2 : index
    %c0_7 = arith.constant 0 : index
    %c0_8 = arith.constant 0 : index
    %7 = vector.load %arg1[%c0_6, %c2, %c0_7, %c0_8] : memref<1x3x400x128xbf16, #tpu.memory_space<vmem>>, vector<1x1x400x128xbf16>
    %8 = vector.shape_cast %7 : vector<1x1x400x128xbf16> to vector<400x128xbf16>
    %9 = arith.extf %8 : vector<400x128xbf16> to vector<400x128xf32>
    %10 = arith.addf %6, %9 : vector<400x128xf32>
    %cst = arith.constant 0.00520833349 : f32
    %11 = vector.broadcast %cst : f32 to vector<400x128xf32>
    %12 = arith.mulf %10, %11 : vector<400x128xf32>
    %13 = math.floor %12 : vector<400x128xf32>
    %cst_9 = arith.constant 3.000000e+00 : f32
    %14 = vector.broadcast %cst_9 : f32 to vector<400x128xf32>
    %15 = arith.minimumf %13, %14 : vector<400x128xf32>
    %cst_10 = arith.constant 0.000000e+00 : f32
    %16 = vector.broadcast %cst_10 : f32 to vector<400x128xf32>
    %17 = arith.cmpf oeq, %15, %16 : vector<400x128xf32>
    %18 = arith.extui %17 : vector<400x128xi1> to vector<400x128xi32>
    %19 = arith.sitofp %18 : vector<400x128xi32> to vector<400x128xf32>
    %cst_11 = arith.constant dense<0.000000e+00> : vector<128xf32>
    %20 = vector.multi_reduction <add>, %19, %cst_11 [0] : vector<400x128xf32> to vector<128xf32>
    %21 = vector.shape_cast %20 : vector<128xf32> to vector<1x128xf32>
    %cst_12 = arith.constant 0.000000e+00 : f32
    %22 = vector.broadcast %cst_12 : f32 to vector<1x128xf32>
    %cst_13 = arith.constant 1.000000e+00 : f32
    %23 = vector.broadcast %cst_13 : f32 to vector<400x128xf32>
    %24 = arith.cmpf oeq, %15, %23 : vector<400x128xf32>
    %25 = arith.extui %24 : vector<400x128xi1> to vector<400x128xi32>
    %26 = arith.sitofp %25 : vector<400x128xi32> to vector<400x128xf32>
    %cst_14 = arith.constant dense<0.000000e+00> : vector<128xf32>
    %27 = vector.multi_reduction <add>, %26, %cst_14 [0] : vector<400x128xf32> to vector<128xf32>
    %28 = vector.shape_cast %27 : vector<128xf32> to vector<1x128xf32>
    %29 = arith.cmpf ogt, %28, %21 : vector<1x128xf32>
    %cst_15 = arith.constant 1.000000e+00 : f32
    %30 = vector.broadcast %cst_15 : f32 to vector<1x128xf32>
    %31 = arith.select %29, %30, %22 : vector<1x128xi1>, vector<1x128xf32>
    %32 = arith.select %29, %28, %21 : vector<1x128xi1>, vector<1x128xf32>
    %cst_16 = arith.constant 2.000000e+00 : f32
    %33 = vector.broadcast %cst_16 : f32 to vector<400x128xf32>
    %34 = arith.cmpf oeq, %15, %33 : vector<400x128xf32>
    %35 = arith.extui %34 : vector<400x128xi1> to vector<400x128xi32>
    %36 = arith.sitofp %35 : vector<400x128xi32> to vector<400x128xf32>
    %cst_17 = arith.constant dense<0.000000e+00> : vector<128xf32>
    %37 = vector.multi_reduction <add>, %36, %cst_17 [0] : vector<400x128xf32> to vector<128xf32>
    %38 = vector.shape_cast %37 : vector<128xf32> to vector<1x128xf32>
    %39 = arith.cmpf ogt, %38, %32 : vector<1x128xf32>
    %cst_18 = arith.constant 2.000000e+00 : f32
    %40 = vector.broadcast %cst_18 : f32 to vector<1x128xf32>
    %41 = arith.select %39, %40, %31 : vector<1x128xi1>, vector<1x128xf32>
    %42 = arith.select %39, %38, %32 : vector<1x128xi1>, vector<1x128xf32>
    %cst_19 = arith.constant 3.000000e+00 : f32
    %43 = vector.broadcast %cst_19 : f32 to vector<400x128xf32>
    %44 = arith.cmpf oeq, %15, %43 : vector<400x128xf32>
    %45 = arith.extui %44 : vector<400x128xi1> to vector<400x128xi32>
    %46 = arith.sitofp %45 : vector<400x128xi32> to vector<400x128xf32>
    %cst_20 = arith.constant dense<0.000000e+00> : vector<128xf32>
    %47 = vector.multi_reduction <add>, %46, %cst_20 [0] : vector<400x128xf32> to vector<128xf32>
    %48 = vector.shape_cast %47 : vector<128xf32> to vector<1x128xf32>
    %49 = arith.cmpf ogt, %48, %42 : vector<1x128xf32>
    %cst_21 = arith.constant 3.000000e+00 : f32
    %50 = vector.broadcast %cst_21 : f32 to vector<1x128xf32>
    %51 = arith.select %49, %50, %41 : vector<1x128xi1>, vector<1x128xf32>
    %52 = arith.select %49, %48, %42 : vector<1x128xi1>, vector<1x128xf32>
    %53 = vector.broadcast %51 : vector<1x128xf32> to vector<400x128xf32>
    %54 = arith.cmpf oeq, %15, %53 : vector<400x128xf32>
    %55 = arith.extui %54 : vector<400x128xi1> to vector<400x128xi32>
    %56 = arith.sitofp %55 : vector<400x128xi32> to vector<400x128xf32>
    %cst_22 = arith.constant 1.000000e+00 : f32
    %57 = vector.broadcast %cst_22 : f32 to vector<1x128xf32>
    %58 = arith.maximumf %52, %57 : vector<1x128xf32>
    %59 = tpu.reciprocal %58 {approx = true} : vector<1x128xf32> -> vector<1x128xf32>
    %c0_23 = arith.constant 0 : index
    %c0_24 = arith.constant 0 : index
    %c0_25 = arith.constant 0 : index
    %c0_26 = arith.constant 0 : index
    %60 = vector.load %arg1[%c0_23, %c0_24, %c0_25, %c0_26] : memref<1x3x400x128xbf16, #tpu.memory_space<vmem>>, vector<1x1x400x128xbf16>
    %61 = vector.shape_cast %60 : vector<1x1x400x128xbf16> to vector<400x128xbf16>
    %62 = arith.extf %61 : vector<400x128xbf16> to vector<400x128xf32>
    %63 = arith.mulf %62, %56 : vector<400x128xf32>
    %cst_27 = arith.constant dense<0.000000e+00> : vector<128xf32>
    %64 = vector.multi_reduction <add>, %63, %cst_27 [0] : vector<400x128xf32> to vector<128xf32>
    %65 = vector.shape_cast %64 : vector<128xf32> to vector<1x128xf32>
    %66 = arith.mulf %65, %59 : vector<1x128xf32>
    %c0_28 = arith.constant 0 : index
    %c0_29 = arith.constant 0 : index
    %67 = vector.load %arg2[%c0_28, %c0_29] : memref<3x128xf32, #tpu.memory_space<vmem>>, vector<1x128xf32>
    tpu.vector_store %arg2[%c0_28, %c0_29], %66 {strides = array<i32>} : memref<3x128xf32, #tpu.memory_space<vmem>>, vector<1x128xf32>,
    %c0_30 = arith.constant 0 : index
    %c1_31 = arith.constant 1 : index
    %c0_32 = arith.constant 0 : index
    %c0_33 = arith.constant 0 : index
    %68 = vector.load %arg1[%c0_30, %c1_31, %c0_32, %c0_33] : memref<1x3x400x128xbf16, #tpu.memory_space<vmem>>, vector<1x1x400x128xbf16>
    %69 = vector.shape_cast %68 : vector<1x1x400x128xbf16> to vector<400x128xbf16>
    %70 = arith.extf %69 : vector<400x128xbf16> to vector<400x128xf32>
    %71 = arith.mulf %70, %56 : vector<400x128xf32>
    %cst_34 = arith.constant dense<0.000000e+00> : vector<128xf32>
    %72 = vector.multi_reduction <add>, %71, %cst_34 [0] : vector<400x128xf32> to vector<128xf32>
    %73 = vector.shape_cast %72 : vector<128xf32> to vector<1x128xf32>
    %74 = arith.mulf %73, %59 : vector<1x128xf32>
    %c1_35 = arith.constant 1 : index
    %c0_36 = arith.constant 0 : index
    %75 = vector.load %arg2[%c1_35, %c0_36] : memref<3x128xf32, #tpu.memory_space<vmem>>, vector<1x128xf32>
    tpu.vector_store %arg2[%c1_35, %c0_36], %74 {strides = array<i32>} : memref<3x128xf32, #tpu.memory_space<vmem>>, vector<1x128xf32>,
    %c0_37 = arith.constant 0 : index
    %c2_38 = arith.constant 2 : index
    %c0_39 = arith.constant 0 : index
    %c0_40 = arith.constant 0 : index
    %76 = vector.load %arg1[%c0_37, %c2_38, %c0_39, %c0_40] : memref<1x3x400x128xbf16, #tpu.memory_space<vmem>>, vector<1x1x400x128xbf16>
    %77 = vector.shape_cast %76 : vector<1x1x400x128xbf16> to vector<400x128xbf16>
    %78 = arith.extf %77 : vector<400x128xbf16> to vector<400x128xf32>
    %79 = arith.mulf %78, %56 : vector<400x128xf32>
    %cst_41 = arith.constant dense<0.000000e+00> : vector<128xf32>
    %80 = vector.multi_reduction <add>, %79, %cst_41 [0] : vector<400x128xf32> to vector<128xf32>
    %81 = vector.shape_cast %80 : vector<128xf32> to vector<1x128xf32>
    %82 = arith.mulf %81, %59 : vector<1x128xf32>
    %c2_42 = arith.constant 2 : index
    %c0_43 = arith.constant 0 : index
    %83 = vector.load %arg2[%c2_42, %c0_43] : memref<3x128xf32, #tpu.memory_space<vmem>>, vector<1x128xf32>
    tpu.vector_store %arg2[%c2_42, %c0_43], %82 {strides = array<i32>} : memref<3x128xf32, #tpu.memory_space<vmem>>, vector<1x128xf32>,
    return
  }
  func.func @transform_0(%arg0: i32) -> (i32, i32, i32, i32) {
    %c0_i32 = arith.constant 0 : i32
    %c0_i32_0 = arith.constant 0 : i32
    %c0_i32_1 = arith.constant 0 : i32
    %c0_i32_2 = arith.constant 0 : i32
    return %arg0, %c0_i32, %c0_i32_0, %c0_i32_1 : i32, i32, i32, i32
  }
  func.func @transform_1(%arg0: i32) -> (i32, i32) {
    %c0_i32 = arith.constant 0 : i32
    %c0_i32_0 = arith.constant 0 : i32
    return %c0_i32, %arg0 : i32, i32
  }
}

</mosaic_0001>

<bundles_post_ra>
// kernel: photo2pixel_forward.1
= control target key start
LH: loop header
LB: loop body
LE: loop exit
PB: predicated region body
PF: predicated region fallthrough
CT: control target
= control target key end

     0   :  { %s5652_s0 = inlined_call_operand.vmem [shape: bf16[1,3,400,128], index: 0, kind: input, shape index: {}]   ;;  %s5653_s1 = inlined_call_operand.vmem [shape: f32[3,128], index: 1, kind: output, shape index: {}]  }
   0x1   :  { %v3157_v0 = vld [vmem:[%s5652_s0] sm:$0xff]   ;;  %v3162_v1 = vld [vmem:[%s5652_s0 + $0x8] sm:$0xff]   ;;  %v3167_v2 = vld [vmem:[%s5652_s0 + $0x10] sm:$0xff]  }
   0x2   :  { %5776 = vst [vmem:[#allocation2_spill] sm:$0xff] %v3157_v0  ;;  %v3172_v3 = vld [vmem:[%s5652_s0 + $0x18] sm:$0xff]   ;;  %v3177_v4 = vld [vmem:[%s5652_s0 + $0x20] sm:$0xff]   ;;  %v3182_v5 = vld [vmem:[%s5652_s0 + $0x28] sm:$0xff]  }
   0x3   :  { %5777 = vst [vmem:[#allocation3_spill] sm:$0xff] %v3162_v1  ;;  %v3191_v10 = vld [vmem:[%s5652_s0 + $0x30] sm:$0xff]   ;;  %v3196_v11 = vld [vmem:[%s5652_s0 + $0x38] sm:$0xff]   ;;  %v3205_v16 = vld [vmem:[%s5652_s0 + $0x40] sm:$0xff]  }
   0x4   :  { %5778 = vst [vmem:[#allocation4_spill] sm:$0xff] %v3167_v2  ;;  %v3210_v17 = vld [vmem:[%s5652_s0 + $0x48] sm:$0xff]   ;;  %v3219_v22 = vld [vmem:[%s5652_s0 + $0x50] sm:$0xff]   ;;  %v3224_v23 = vld [vmem:[%s5652_s0 + $0x58] sm:$0xff]  }
   0x5   :  { %5779 = vst [vmem:[#allocation5_spill] sm:$0xff] %v3172_v3  ;;  %v3233_v28 = vld [vmem:[%s5652_s0 + $0x60] sm:$0xff]   ;;  %v3238_v29 = vld [vmem:[%s5652_s0 + $0x68] sm:$0xff]   ;;  %v3247_v34 = vld [vmem:[%s5652_s0 + $0x70] sm:$0xff]  }
   0x6   :  { %5780 = vst [vmem:[#allocation6_spill] sm:$0xff] %v3177_v4  ;;  %v3252_v35 = vld [vmem:[%s5652_s0 + $0x78] sm:$0xff]   ;;  %v3261_v40 = vld [vmem:[%s5652_s0 + $0x80] sm:$0xff]   ;;  %v3266_v41 = vld [vmem:[%s5652_s0 + $0x88] sm:$0xff]  }
   0x7   :  { %5781 = vst [vmem:[#allocation7_spill] sm:$0xff] %v3182_v5  ;;  %v3275_v46 = vld [vmem:[%s5652_s0 + $0x90] sm:$0xff]   ;;  %v3280_v47 = vld [vmem:[%s5652_s0 + $0x98] sm:$0xff]   ;;  %v3289_v52 = vld [vmem:[%s5652_s0 + $0xa0] sm:$0xff]  }
   0x8   :  { %5782 = vst [vmem:[#allocation8_spill] sm:$0xff] %v3191_v10  ;;  %v3294_v53 = vld [vmem:[%s5652_s0 + $0xa8] sm:$0xff]   ;;  %v3303_v58 = vld [vmem:[%s5652_s0 + $0xb0] sm:$0xff]   ;;  %v3308_v59 = vld [vmem:[%s5652_s0 + $0xb8] sm:$0xff]  }
   0x9   :  { %5783 = vst [vmem:[#allocation9_spill] sm:$0xff] %v3196_v11  ;;  %v3317_v57 = vld [vmem:[%s5652_s0 + $0xc0] sm:$0xff]   ;;  %v3322_v56 = vld [vmem:[%s5652_s0 + $0xc8] sm:$0xff]   ;;  %v3331_v63 = vld [vmem:[%s5652_s0 + $0xd0] sm:$0xff]  }
   0xa   :  { %5784 = vst [vmem:[#allocation10_spill] sm:$0xff] %v3205_v16  ;;  %v3336_v54 = vld [vmem:[%s5652_s0 + $0xd8] sm:$0xff]   ;;  %v3345_v62 = vld [vmem:[%s5652_s0 + $0xe0] sm:$0xff]   ;;  %v3350_v50 = vld [vmem:[%s5652_s0 + $0xe8] sm:$0xff]  }
   0xb   :  { %5785 = vst [vmem:[#allocation11_spill] sm:$0xff] %v3210_v17  ;;  %v3359_v61 = vld [vmem:[%s5652_s0 + $0xf0] sm:$0xff]   ;;  %v3364_v48 = vld [vmem:[%s5652_s0 + $0xf8] sm:$0xff]   ;;  %v3373_v43 = vld [vmem:[%s5652_s0 + $0x100] sm:$0xff]  }
   0xc   :  { %5786 = vst [vmem:[#allocation12_spill] sm:$0xff] %v3219_v22  ;;  %v3378_v42 = vld [vmem:[%s5652_s0 + $0x108] sm:$0xff]   ;;  %v3387_v33 = vld [vmem:[%s5652_s0 + $0x110] sm:$0xff]   ;;  %v3392_v32 = vld [vmem:[%s5652_s0 + $0x118] sm:$0xff]   ;;  %v2646_v21 = vunpack.c.l.bf16 %v3373_v43  ;;  %v2647_v31 = vunpack.c.h.bf16 %v3373_v43  ;;  %v5808_v22 = vunpack.c.h.bf16 %v3331_v63 }
   0xd   :  { %5787 = vst [vmem:[#allocation13_spill] sm:$0xff] %v3224_v23  ;;  %v3401_v25 = vld [vmem:[%s5652_s0 + $0x120] sm:$0xff]   ;;  %v3406_v24 = vld [vmem:[%s5652_s0 + $0x128] sm:$0xff]   ;;  %v2650_v30 = vunpack.c.l.bf16 %v3378_v42  ;;  %v2651_v27 = vunpack.c.h.bf16 %v3378_v42  ;;  %v3415_v26 = vld [vmem:[%s5652_s0 + $0x130] sm:$0xff]   ;;  %v2654_v36 = vunpack.c.l.bf16 %v3387_v33  ;;  %v2655_v19 = vunpack.c.h.bf16 %v3387_v33 }
   0xe   :  { %5788 = vst [vmem:[#allocation14_spill] sm:$0xff] %v3233_v28  ;;  %v3420_v20 = vld [vmem:[%s5652_s0 + $0x138] sm:$0xff]   ;;  %v2658_v43 = vunpack.c.l.bf16 %v3392_v32  ;;  %v2659_v37 = vunpack.c.h.bf16 %v3392_v32  ;;  %v3429_v42 = vld [vmem:[%s5652_s0 + $0x140] sm:$0xff]   ;;  %v3434_v18 = vld [vmem:[%s5652_s0 + $0x148] sm:$0xff]   ;;  %v2662_v38 = vunpack.c.l.bf16 %v3401_v25  ;;  %v2663_v15 = vunpack.c.h.bf16 %v3401_v25 }
   0xf   :  { %5789 = vst [vmem:[#allocation15_spill] sm:$0xff] %v3238_v29  ;;  %v2666_v33 = vunpack.c.l.bf16 %v3406_v24  ;;  %v2667_v39 = vunpack.c.h.bf16 %v3406_v24  ;;  %v3443_v32 = vld [vmem:[%s5652_s0 + $0x150] sm:$0xff]   ;;  %v3448_v14 = vld [vmem:[%s5652_s0 + $0x158] sm:$0xff]   ;;  %v2670_v44 = vunpack.c.l.bf16 %v3415_v26  ;;  %v2671_v13 = vunpack.c.h.bf16 %v3415_v26  ;;  %v3457_v24 = vld [vmem:[%s5652_s0 + $0x160] sm:$0xff]  }
  0x10   :  { %5790 = vst [vmem:[#allocation16_spill] sm:$0xff] %v3247_v34  ;;  %v2674_v25 = vunpack.c.l.bf16 %v3420_v20  ;;  %v2675_v51 = vunpack.c.h.bf16 %v3420_v20  ;;  %v3462_v12 = vld [vmem:[%s5652_s0 + $0x168] sm:$0xff]   ;;  %v2678_v49 = vunpack.c.l.bf16 %v3429_v42  ;;  %v2679_v9 = vunpack.c.h.bf16 %v3429_v42  ;;  %v3471_v20 = vld [vmem:[%s5652_s0 + $0x170] sm:$0xff]   ;;  %v3476_v8 = vld [vmem:[%s5652_s0 + $0x178] sm:$0xff]  }
  0x11   :  { %5791 = vst [vmem:[#allocation17_spill] sm:$0xff] %v3252_v35  ;;  %v2682_v26 = vunpack.c.l.bf16 %v3434_v18  ;;  %v2683_v45 = vunpack.c.h.bf16 %v3434_v18  ;;  %v2686_v60 = vunpack.c.l.bf16 %v3443_v32  ;;  %v2687_v7 = vunpack.c.h.bf16 %v3443_v32  ;;  %v3485_v18 = vld [vmem:[%s5652_s0 + $0x180] sm:$0xff]   ;;  %v3490_v6 = vld [vmem:[%s5652_s0 + $0x188] sm:$0xff]  }
  0x12   :  { %5792 = vst [vmem:[#allocation18_spill] sm:$0xff] %v3261_v40  ;;  %v2690_v42 = vunpack.c.l.bf16 %v3448_v14  ;;  %v2691_v55 = vunpack.c.h.bf16 %v3448_v14  ;;  %v2698_v32 = vunpack.c.l.bf16 %v3462_v12  ;;  %v2702_v14 = vunpack.c.l.bf16 %v3471_v20 }
  0x13   :  { %5793 = vst [vmem:[#allocation19_spill] sm:$0xff] %v3266_v41  ;;  %v2711_v41 = vunpack.c.h.bf16 %v3485_v18  ;;  %v2714_v40 = vunpack.c.l.bf16 %v3490_v6  ;;  %v5801_v35 = vunpack.c.l.bf16 %v3157_v0  ;;  %v5804_v29 = vunpack.c.h.bf16 %v3322_v56 }
  0x14   :  { %5794 = vst [vmem:[#allocation20_spill] sm:$0xff] %v3275_v46  ;;  %v2710_v46 = vunpack.c.l.bf16 %v3485_v18  ;;  %v5806_v18 = vunpack.c.l.bf16 %v3331_v63  ;;  %v5816_v63 = vunpack.c.h.bf16 %v3345_v62 }
  0x15   :  { %5795 = vst [vmem:[#allocation21_spill] sm:$0xff] %v3280_v47  ;;  %v2707_v47 = vunpack.c.h.bf16 %v3476_v8 }
  0x16   :  { %5796 = vst [vmem:[#allocation22_spill] sm:$0xff] %v3289_v52  ;;  %v2706_v52 = vunpack.c.l.bf16 %v3476_v8  ;;  %v5805_v8 = vunpack.c.l.bf16 %v3162_v1 }
  0x17   :  { %5797 = vst [vmem:[#allocation23_spill] sm:$0xff] %v3294_v53  ;;  %v2703_v53 = vunpack.c.h.bf16 %v3471_v20  ;;  %v5803_v20 = vunpack.c.h.bf16 %v3157_v0 }
  0x18   :  { %5798 = vst [vmem:[#allocation24_spill] sm:$0xff] %v3303_v58  ;;  %v2699_v58 = vunpack.c.h.bf16 %v3462_v12  ;;  %v5802_v12 = vunpack.c.l.bf16 %v3322_v56  ;;  %v3520_v23 = vadd.f32 %v5806_v18, %v5805_v8  ;;  %v5812_v56 = vunpack.c.h.bf16 %v3336_v54 }
  0x19   :  { %5799 = vst [vmem:[#allocation25_spill] sm:$0xff] %v3308_v59  ;;  %v2695_v59 = vunpack.c.h.bf16 %v3457_v24  ;;  %v3514_v28 = vadd.f32 %v5804_v29, %v5803_v20  ;;  %v5811_v29 = vunpack.c.h.bf16 %v3167_v2  ;;  %v5813_v8 = vunpack.c.l.bf16 %v3172_v3 }
  0x1a   :  { %5800 = vst [vmem:[#allocation26_spill] sm:$0xff] %v3317_v57  ;;  %v2694_v57 = vunpack.c.l.bf16 %v3457_v24  ;;  %v2715_v24 = vunpack.c.h.bf16 %v3490_v6  ;;  %v3508_v34 = vadd.f32 %v5802_v12, %v5801_v35  ;;  %v5807_v6 = vunpack.c.h.bf16 %v3162_v1 }
  0x1b   :  { %v5809_v35 = vunpack.c.l.bf16 %v3167_v2  ;;  %v5810_v12 = vunpack.c.l.bf16 %v3336_v54  ;;  %v3538_v20 = vadd.f32 %v5812_v56, %v5811_v29  ;;  %v5814_v18 = vunpack.c.l.bf16 %v3345_v62 }
  0x1c   :  { %v3526_v17 = vadd.f32 %v5808_v22, %v5807_v6  ;;  %v5815_v22 = vunpack.c.h.bf16 %v3172_v3  ;;  %v5819_v54 = vunpack.c.h.bf16 %v3177_v4  ;;  %v5820_v29 = vunpack.c.h.bf16 %v3350_v50 }
  0x1d   :  { %v3532_v0 = vadd.f32 %v5810_v12, %v5809_v35  ;;  %v3544_v1 = vadd.f32 %v5814_v18, %v5813_v8  ;;  %v5817_v35 = vunpack.c.l.bf16 %v3177_v4  ;;  %v5818_v12 = vunpack.c.l.bf16 %v3350_v50 }
  0x1e   :  { %v3550_v6 = vadd.f32 %v5816_v63, %v5815_v22  ;;  %v3562_v56 = vadd.f32 %v5820_v29, %v5819_v54  ;;  %v5821_v8 = vunpack.c.l.bf16 %v3182_v5  ;;  %v5822_v18 = vunpack.c.l.bf16 %v3359_v61 }
  0x1f   :  { %v3556_v2 = vadd.f32 %v5818_v12, %v5817_v35  ;;  %v5823_v62 = vunpack.c.h.bf16 %v3182_v5  ;;  %v5824_v22 = vunpack.c.h.bf16 %v3359_v61  ;;  %v5825_v35 = vunpack.c.l.bf16 %v3191_v10 }
  0x20   :  { %v3568_v3 = vadd.f32 %v5822_v18, %v5821_v8  ;;  %v5826_v12 = vunpack.c.l.bf16 %v3364_v48  ;;  %v5827_v50 = vunpack.c.h.bf16 %v3191_v10  ;;  %v5828_v54 = vunpack.c.h.bf16 %v3364_v48  ;;  %v5833_v10 = vld [vmem:[#allocation11_spill] sm:$0xff] }
  0x21   :  { %v3574_v63 = vadd.f32 %v5824_v22, %v5823_v62  ;;  %v5829_v8 = vunpack.c.l.bf16 %v3196_v11  ;;  %v5830_v61 = vunpack.c.h.bf16 %v3196_v11  ;;  %v5831_v22 = vunpack.c.l.bf16 %v3205_v16 }
  0x22   :  { %v3580_v4 = vadd.f32 %v5826_v12, %v5825_v35  ;;  %v3586_v29 = vadd.f32 %v5828_v54, %v5827_v50  ;;  %v5832_v35 = vunpack.c.h.bf16 %v3205_v16  ;;  %v5834_v48 = vunpack.c.l.bf16 %v5833_v10 }
  0x23   :  { %v3590_v18 = vadd.f32 %v2646_v21, %v5829_v8  ;;  %v3594_v62 = vadd.f32 %v2647_v31, %v5830_v61  ;;  %v3598_v5 = vadd.f32 %v2650_v30, %v5831_v22  ;;  %v5835_v54 = vunpack.c.h.bf16 %v5833_v10  ;;  %v5836_v8 = vld [vmem:[#allocation12_spill] sm:$0xff]  ;;  %v5839_v22 = vld [vmem:[#allocation13_spill] sm:$0xff] }
  0x24   :  { %v3602_v12 = vadd.f32 %v2651_v27, %v5832_v35  ;;  %v3606_v50 = vadd.f32 %v2654_v36, %v5834_v48  ;;  %v5837_v11 = vunpack.c.l.bf16 %v5836_v8  ;;  %v5838_v61 = vunpack.c.h.bf16 %v5836_v8  ;;  %v5842_v48 = vld [vmem:[#allocation14_spill] sm:$0xff] }
  0x25   :  { %v3610_v21 = vadd.f32 %v2655_v19, %v5835_v54  ;;  %v5840_v16 = vunpack.c.l.bf16 %v5839_v22  ;;  %v5841_v35 = vunpack.c.h.bf16 %v5839_v22  ;;  %v5843_v10 = vunpack.c.l.bf16 %v5842_v48 }
  0x26   :  { %v3614_v31 = vadd.f32 %v2658_v43, %v5837_v11  ;;  %v3618_v30 = vadd.f32 %v2659_v37, %v5838_v61  ;;  %v5844_v54 = vunpack.c.h.bf16 %v5842_v48  ;;  %v5845_v43 = vld [vmem:[#allocation15_spill] sm:$0xff] }
  0x27   :  { %v3622_v27 = vadd.f32 %v2662_v38, %v5840_v16  ;;  %v3626_v36 = vadd.f32 %v2663_v15, %v5841_v35  ;;  %v3630_v19 = vadd.f32 %v2666_v33, %v5843_v10  ;;  %v5846_v8 = vunpack.c.l.bf16 %v5845_v43  ;;  %v5848_v38 = vld [vmem:[#allocation16_spill] sm:$0xff]  ;;  %v5851_v33 = vld [vmem:[#allocation17_spill] sm:$0xff] }
  0x28   :  { %v3634_v11 = vadd.f32 %v2667_v39, %v5844_v54  ;;  %v5847_v61 = vunpack.c.h.bf16 %v5845_v43  ;;  %v5849_v22 = vunpack.c.l.bf16 %v5848_v38  ;;  %v5850_v35 = vunpack.c.h.bf16 %v5848_v38 }
  0x29   :  { %v3638_v37 = vadd.f32 %v2670_v44, %v5846_v8  ;;  %v5852_v48 = vunpack.c.l.bf16 %v5851_v33  ;;  %v5853_v54 = vunpack.c.h.bf16 %v5851_v33  ;;  %v5855_v8 = vld [vmem:[#allocation18_spill] sm:$0xff] }
  0x2a   :  { %v3642_v16 = vadd.f32 %v2671_v13, %v5847_v61  ;;  %v3646_v15 = vadd.f32 %v2674_v25, %v5849_v22  ;;  %v3650_v10 = vadd.f32 %v2675_v51, %v5850_v35  ;;  %v5856_v43 = vunpack.c.l.bf16 %v5855_v8  ;;  %v5860_v22 = vld [vmem:[#allocation19_spill] sm:$0xff] }
  0x2b   :  { %v3654_v39 = vadd.f32 %v2678_v49, %v5852_v48  ;;  %v3658_v44 = vadd.f32 %v2679_v9, %v5853_v54  ;;  %v5858_v61 = vunpack.c.h.bf16 %v5855_v8  ;;  %v5861_v38 = vunpack.c.l.bf16 %v5860_v22  ;;  %v5865_v48 = vld [vmem:[#allocation20_spill] sm:$0xff] }
  0x2c   :  { %v3662_v13 = vadd.f32 %v2682_v26, %v5856_v43  ;;  %v5863_v35 = vunpack.c.h.bf16 %v5860_v22  ;;  %v5866_v33 = vunpack.c.l.bf16 %v5865_v48  ;;  %v5868_v54 = vunpack.c.h.bf16 %v5865_v48  ;;  %v5870_v43 = vld [vmem:[#allocation21_spill] sm:$0xff]  ;;  %v3742_v22 = vld [vmem:[%s5652_s0 + $0x1a8] sm:$0xff]  }
  0x2d   :  { %5854 = vst [vmem:[#allocation27_spill] sm:$0xff] %v3658_v44  ;;  %v3666_v25 = vadd.f32 %v2683_v45, %v5858_v61  ;;  %v3670_v51 = vadd.f32 %v2686_v60, %v5861_v38  ;;  %v5871_v8 = vunpack.c.l.bf16 %v5870_v43  ;;  %v5873_v61 = vunpack.c.h.bf16 %v5870_v43  ;;  %v5875_v38 = vld [vmem:[#allocation22_spill] sm:$0xff]  ;;  %v3716_v43 = vld [vmem:[%s5652_s0 + $0x198] sm:$0xff]  }
  0x2e   :  { %5857 = vst [vmem:[#allocation28_spill] sm:$0xff] %v3662_v13  ;;  %v3674_v49 = vadd.f32 %v2687_v7, %v5863_v35  ;;  %v3678_v9 = vadd.f32 %v2690_v42, %v5866_v33  ;;  %v3682_v26 = vadd.f32 %v2691_v55, %v5868_v54  ;;  %v3695_v7 = vld [vmem:[%s5652_s0 + $0x190] sm:$0xff]   ;;  %v5876_v42 = vunpack.c.l.bf16 %v5875_v38  ;;  %v5880_v54 = vld [vmem:[#allocation23_spill] sm:$0xff] }
  0x2f   :  { %5859 = vst [vmem:[#allocation29_spill] sm:$0xff] %v3666_v25  ;;  %v3686_v45 = vadd.f32 %v2694_v57, %v5871_v8  ;;  %v3690_v60 = vadd.f32 %v2695_v59, %v5873_v61  ;;  %v5878_v55 = vunpack.c.h.bf16 %v5875_v38  ;;  %v5881_v57 = vunpack.c.l.bf16 %v5880_v54 }
  0x30   :  { %5862 = vst [vmem:[#allocation30_spill] sm:$0xff] %v3670_v51  ;;  %v3699_v33 = vadd.f32 %v2698_v32, %v5876_v42  ;;  %v5883_v59 = vunpack.c.h.bf16 %v5880_v54  ;;  %v3721_v32 = vld [vmem:[%s5652_s0 + $0x1a0] sm:$0xff]   ;;  %v5903_v44 = vunpack.c.h.bf16 %v3716_v43 }
  0x31   :  { %5864 = vst [vmem:[#allocation31_spill] sm:$0xff] %v3674_v49  ;;  %v3703_v35 = vadd.f32 %v2699_v58, %v5878_v55  ;;  %v3707_v8 = vadd.f32 %v2702_v14, %v5881_v57  ;;  %v5885_v58 = vld [vmem:[#allocation24_spill] sm:$0xff] }
  0x32   :  { %5867 = vst [vmem:[#allocation32_spill] sm:$0xff] %v3678_v9  ;;  %v3711_v61 = vadd.f32 %v2703_v53, %v5883_v59  ;;  %v5886_v42 = vunpack.c.l.bf16 %v5885_v58  ;;  %v5888_v14 = vunpack.c.h.bf16 %v5885_v58  ;;  %v5890_v53 = vld [vmem:[#allocation25_spill] sm:$0xff]  ;;  %v3767_v58 = vld [vmem:[%s5652_s0 + $0x1c0] sm:$0xff]   ;;  %v3869_v9 = vld [vmem:[%s5652_s0 + $0x230] sm:$0xff]   ;;  %v363_v13 = vadd.f32 %v5903_v44, %v3526_v17 }
  0x33   :  { %5869 = vst [vmem:[#allocation33_spill] sm:$0xff] %v3682_v26  ;;  %v5891_v59 = vunpack.c.l.bf16 %v5890_v53  ;;  %v5893_v38 = vunpack.c.h.bf16 %v5890_v53  ;;  %v3762_v53 = vld [vmem:[%s5652_s0 + $0x1b8] sm:$0xff]   ;;  %v3886_v26 = vld [vmem:[%s5652_s0 + $0x248] sm:$0xff]   ;;  %v5907_v17 = vunpack.c.h.bf16 %v3742_v22 }
  0x34   :  { %5872 = vst [vmem:[#allocation34_spill] sm:$0xff] %v3686_v45  ;;  %v3725_v55 = vadd.f32 %v2706_v52, %v5886_v42  ;;  %v3729_v57 = vadd.f32 %v2707_v47, %v5888_v14  ;;  %v3747_v52 = vld [vmem:[%s5652_s0 + $0x1b0] sm:$0xff]   ;;  %v5895_v47 = vld [vmem:[#allocation26_spill] sm:$0xff] }
  0x35   :  { %5874 = vst [vmem:[#allocation35_spill] sm:$0xff] %v3690_v60  ;;  %v3733_v54 = vadd.f32 %v2710_v46, %v5891_v59  ;;  %v3737_v48 = vadd.f32 %v2711_v41, %v5893_v38  ;;  %v5896_v42 = vunpack.c.l.bf16 %v5895_v47  ;;  %v5898_v46 = vunpack.c.h.bf16 %v5895_v47  ;;  %v3781_v47 = vld [vmem:[%s5652_s0 + $0x1d0] sm:$0xff]   ;;  %v3881_v45 = vld [vmem:[%s5652_s0 + $0x240] sm:$0xff]  }
  0x36   :  { %5877 = vst [vmem:[#allocation36_spill] sm:$0xff] %v3699_v33  ;;  %v2718_v41 = vunpack.c.l.bf16 %v3695_v7  ;;  %v2719_v38 = vunpack.c.h.bf16 %v3695_v7  ;;  %v3776_v7 = vld [vmem:[%s5652_s0 + $0x1c8] sm:$0xff]   ;;  %v3874_v33 = vld [vmem:[%s5652_s0 + $0x238] sm:$0xff]   ;;  %v367_v44 = vadd.f32 %v5907_v17, %v3550_v6  ;;  %v5912_v6 = vunpack.c.l.bf16 %v3767_v58 }
  0x37   :  { %5879 = vst [vmem:[#allocation37_spill] sm:$0xff] %v3703_v35  ;;  %v3751_v14 = vadd.f32 %v2714_v40, %v5896_v42  ;;  %v3755_v59 = vadd.f32 %v2715_v24, %v5898_v46  ;;  %v2722_v40 = vunpack.c.l.bf16 %v3716_v43  ;;  %v3790_v46 = vld [vmem:[%s5652_s0 + $0x1d8] sm:$0xff]   ;;  %v3804_v24 = vld [vmem:[%s5652_s0 + $0x1e8] sm:$0xff]   ;;  %v3837_v35 = vld [vmem:[%s5652_s0 + $0x210] sm:$0xff]  }
  0x38   :  { %5882 = vst [vmem:[#allocation38_spill] sm:$0xff] %v3707_v8  ;;  %v3818_v42 = vld [vmem:[%s5652_s0 + $0x1f8] sm:$0xff]   ;;  %v3855_v8 = vld [vmem:[%s5652_s0 + $0x220] sm:$0xff]   ;;  %v360_v60 = vadd.f32 %v2718_v41, %v3508_v34  ;;  %v361_v51 = vadd.f32 %v2719_v38, %v3514_v28  ;;  %v3900_v34 = vld [vmem:[%s5652_s0 + $0x250] sm:$0xff]  }
  0x39   :  { %5884 = vst [vmem:[#allocation39_spill] sm:$0xff] %v3711_v61  ;;  %v3823_v61 = vld [vmem:[%s5652_s0 + $0x200] sm:$0xff]   ;;  %v362_v28 = vadd.f32 %v2722_v40, %v3520_v23  ;;  %v5904_v40 = vunpack.c.l.bf16 %v3721_v32 }
  0x3a   :  { %5887 = vst [vmem:[#allocation40_spill] sm:$0xff] %v3725_v55  ;;  %v410_v49 = vmul.f32 0.0052083335, %v360_v60  ;;  %v411_v25 = vmul.f32 0.0052083335, %v361_v51  ;;  %v5905_v55 = vunpack.c.h.bf16 %v3721_v32  ;;  %v5908_v51 = vunpack.c.l.bf16 %v3747_v52 }
  0x3b   :  { %5889 = vst [vmem:[#allocation41_spill] sm:$0xff] %v3729_v57  ;;  %v3809_v57 = vld [vmem:[%s5652_s0 + $0x1f0] sm:$0xff]   ;;  %v364_v38 = vadd.f32 %v5904_v40, %v3532_v0  ;;  %v412_v60 = vmul.f32 0.0052083335, %v362_v28  ;;  %v5909_v0 = vunpack.c.h.bf16 %v3747_v52 }
  0x3c   :  { %5892 = vst [vmem:[#allocation42_spill] sm:$0xff] %v3733_v54  ;;  %v3860_v54 = vld [vmem:[%s5652_s0 + $0x228] sm:$0xff]   ;;  %v368_v43 = vadd.f32 %v5908_v51, %v3556_v2  ;;  %v5913_v2 = vunpack.c.h.bf16 %v3767_v58  ;;  %v460_v52 = vfloor.f32 %v410_v49  ;;  %v461_v28 = vfloor.f32 %v411_v25 }
  0x3d   :  { %5894 = vst [vmem:[#allocation43_spill] sm:$0xff] %v3737_v48  ;;  %v3795_v48 = vld [vmem:[%s5652_s0 + $0x1e0] sm:$0xff]   ;;  %v369_v40 = vadd.f32 %v5909_v0, %v3562_v56  ;;  %v413_v56 = vmul.f32 0.0052083335, %v363_v13  ;;  %v5918_v25 = vunpack.c.l.bf16 %v3790_v46  ;;  %v5919_v49 = vunpack.c.h.bf16 %v3790_v46 }
  0x3e   :  { %5897 = vst [vmem:[#allocation44_spill] sm:$0xff] %v3751_v14  ;;  %v3832_v14 = vld [vmem:[%s5652_s0 + $0x208] sm:$0xff]   ;;  %v414_v58 = vmul.f32 0.0052083335, %v364_v38 }
  0x3f   :  { %5899 = vst [vmem:[#allocation45_spill] sm:$0xff] %v3755_v59  ;;  %v3846_v59 = vld [vmem:[%s5652_s0 + $0x218] sm:$0xff]  }
  0x40   :  { %5900 = vst [vmem:[#allocation46_spill] sm:$0xff] %v3837_v35  ;;  %v5906_v35 = vunpack.c.l.bf16 %v3742_v22  ;;  %v3942_v22 = vadd.f32 %v5912_v6, %v3580_v4  ;;  %v5916_v4 = vunpack.c.l.bf16 %v3781_v47 }
  0x41   :  { %5901 = vst [vmem:[#allocation47_spill] sm:$0xff] %v3846_v59  ;;  %v365_v59 = vadd.f32 %v5905_v55, %v3538_v20  ;;  %v5910_v20 = vunpack.c.l.bf16 %v3762_v53  ;;  %v3947_v55 = vadd.f32 %v5913_v2, %v3586_v29  ;;  %v5917_v29 = vunpack.c.h.bf16 %v3781_v47 }
  0x42   :  { %5902 = vst [vmem:[#allocation48_spill] sm:$0xff] %v3869_v9  ;;  %v2814_v9 = vunpack.c.l.bf16 %v3900_v34  ;;  %v366_v41 = vadd.f32 %v5906_v35, %v3544_v1  ;;  %v5911_v1 = vunpack.c.h.bf16 %v3762_v53  ;;  %v3962_v51 = vadd.f32 %v5916_v4, %v3598_v5 }
  0x43   :  { %v370_v32 = vadd.f32 %v5910_v20, %v3568_v3  ;;  %v5914_v3 = vunpack.c.l.bf16 %v3776_v7  ;;  %v3967_v13 = vadd.f32 %v5917_v29, %v3602_v12  ;;  %v5920_v5 = vunpack.c.l.bf16 %v3795_v48 }
  0x44   :  { %v3937_v35 = vadd.f32 %v5911_v1, %v3574_v63  ;;  %v5915_v63 = vunpack.c.h.bf16 %v3776_v7  ;;  %v462_v7 = vfloor.f32 %v412_v60  ;;  %v5921_v12 = vunpack.c.h.bf16 %v3795_v48 }
  0x45   :  { %v3952_v17 = vadd.f32 %v5914_v3, %v3590_v18  ;;  %v3972_v18 = vadd.f32 %v5918_v25, %v3606_v50  ;;  %v3982_v0 = vadd.f32 %v5920_v5, %v3614_v31  ;;  %v5922_v50 = vunpack.c.l.bf16 %v3804_v24 }
  0x46   :  { %v3957_v53 = vadd.f32 %v5915_v63, %v3594_v62  ;;  %v3977_v62 = vadd.f32 %v5919_v49, %v3610_v21  ;;  %v3987_v47 = vadd.f32 %v5921_v12, %v3618_v30  ;;  %v415_v46 = vmul.f32 0.0052083335, %v365_v59 }
  0x47   :  { %v3992_v20 = vadd.f32 %v5922_v50, %v3622_v27  ;;  %v5923_v21 = vunpack.c.h.bf16 %v3804_v24  ;;  %v463_v60 = vfloor.f32 %v413_v56  ;;  %v3999_v1 = vmin.f32 %v460_v52, 3.0 }
  0x48   :  { %v4001_v31 = vmin.f32 %v461_v28, 3.0  ;;  %v5924_v30 = vunpack.c.l.bf16 %v3809_v57  ;;  %v5925_v27 = vunpack.c.h.bf16 %v3809_v57  ;;  %v5926_v59 = vunpack.c.l.bf16 %v3818_v42  ;;  %v5940_v5 = vld [vmem:[#allocation47_spill] sm:$0xff] }
  0x49   :  { %v3997_v38 = vadd.f32 %v5923_v21, %v3626_v36  ;;  %v5927_v24 = vunpack.c.h.bf16 %v3818_v42  ;;  %v5928_v56 = vunpack.c.l.bf16 %v3823_v61  ;;  %v416_v52 = vmul.f32 0.0052083335, %v366_v41 }
  0x4a   :  { %v4006_v48 = vadd.f32 %v5924_v30, %v3630_v19  ;;  %v4011_v6 = vadd.f32 %v5925_v27, %v3634_v11  ;;  %v4016_v36 = vadd.f32 %v5926_v59, %v3638_v37  ;;  %v464_v28 = vfloor.f32 %v414_v58  ;;  %v5944_v59 = vld [vmem:[#allocation32_spill] sm:$0xff] }
  0x4b   :  { %v4021_v2 = vadd.f32 %v5927_v24, %v3642_v16  ;;  %v4026_v19 = vadd.f32 %v5928_v56, %v3646_v15  ;;  %v4028_v57 = vmin.f32 %v462_v7, 3.0  ;;  %v5929_v11 = vunpack.c.h.bf16 %v3823_v61  ;;  %v5932_v15 = vld [vmem:[#allocation27_spill] sm:$0xff]  ;;  %v5935_v61 = vld [vmem:[#allocation46_spill] sm:$0xff] }
  0x4c   :  { %v5930_v37 = vunpack.c.l.bf16 %v3832_v14  ;;  %v417_v16 = vmul.f32 0.0052083335, %v367_v44  ;;  %v465_v63 = vfloor.f32 %v415_v46  ;;  %v4040_v4 = vmin.f32 %v463_v60, 3.0  ;;  %v5939_v7 = vld [vmem:[#allocation30_spill] sm:$0xff]  ;;  %v5942_v60 = vld [vmem:[#allocation31_spill] sm:$0xff] }
  0x4d   :  { %v4033_v3 = vadd.f32 %v5929_v11, %v3650_v10  ;;  %vm560_vm0 = vcmp.eq.f32.partialorder %v3999_v1, 0.0  ;;  %vm561_vm1 = vcmp.eq.f32.partialorder %v4001_v31, 0.0  ;;  %v5933_v41 = vunpack.c.h.bf16 %v3832_v14  ;;  %v5934_v10 = vld [vmem:[#allocation28_spill] sm:$0xff] }
  0x4e   :  { %v4038_v42 = vadd.f32 %v5930_v37, %v3654_v39  ;;  %5931 = vst [vmem:[#allocation49_spill] sm:$0xff] %v4040_v4  ;;  %v5936_v25 = vunpack.c.l.bf16 %v5935_v61  ;;  %v5937_v39 = vld [vmem:[#allocation29_spill] sm:$0xff]  ;;  %v5938_v44 = vunpack.c.h.bf16 %v5935_v61  ;;  %v5941_v12 = vunpack.c.l.bf16 %v5940_v5 }
  0x4f   :  { %v4047_v29 = vadd.f32 %v5933_v41, %v5932_v15  ;;  %v418_v46 = vmul.f32 0.0052083335, %v368_v43  ;;  %v466_v21 = vfloor.f32 %v416_v52  ;;  %v4064_v14 = vmin.f32 %v464_v28, 3.0  ;;  %v5947_v41 = vld [vmem:[#allocation33_spill] sm:$0xff] }
  0x50   :  { %v4052_v49 = vadd.f32 %v5936_v25, %v5934_v10  ;;  %v4057_v58 = vadd.f32 %v5938_v44, %v5937_v39  ;;  %v4062_v50 = vadd.f32 %v5941_v12, %v5939_v7  ;;  %vm562_vm2 = vcmp.eq.f32.partialorder %v4028_v57, 0.0  ;;  %v5949_v25 = vld [vmem:[#allocation34_spill] sm:$0xff] }
  0x51   :  { %v5943_v30 = vunpack.c.h.bf16 %v5940_v5  ;;  %v5945_v24 = vunpack.c.l.bf16 %v3855_v8  ;;  %v5767_v11 = vmov 0.0   ;;  %v419_v52 = vmul.f32 0.0052083335, %v369_v40 }
  0x52   :  { %v2166_v37 = vsel %vm560_vm0, 1.0, %v5767_v11  ;;  %v2167_v43 = vsel %vm561_vm1, 1.0, %v5767_v11  ;;  %v467_v28 = vfloor.f32 %v417_v16  ;;  %v4079_v15 = vmin.f32 %v465_v63, 3.0  ;;  %v5951_v63 = vld [vmem:[#allocation35_spill] sm:$0xff] }
  0x53   :  { %v4070_v27 = vadd.f32 %v5943_v30, %v5942_v60  ;;  %v4075_v56 = vadd.f32 %v5945_v24, %v5944_v59  ;;  %vm563_vm3 = vcmp.eq.f32.partialorder %v4040_v4, 0.0  ;;  %v5948_v10 = vunpack.c.h.bf16 %v3855_v8  ;;  %v5953_v30 = vld [vmem:[#allocation36_spill] sm:$0xff] }
  0x54   :  { %5946 = vst [vmem:[#allocation27_spill] sm:$0xff] %v4079_v15  ;;  %v5950_v39 = vunpack.c.l.bf16 %v3860_v54  ;;  %v420_v7 = vmul.f32 0.0052083335, %v370_v32  ;;  %v2168_v5 = vsel %vm562_vm2, 1.0, %v5767_v11  ;;  %v468_v12 = vfloor.f32 %v418_v46  ;;  %v5954_v59 = vld [vmem:[#allocation48_spill] sm:$0xff] }
  0x55   :  { %v4085_v61 = vadd.f32 %v5948_v10, %v5947_v41  ;;  %v4093_v40 = vmin.f32 %v466_v21, 3.0  ;;  %vm564_vm4 = vcmp.eq.f32.partialorder %v4064_v14, 0.0  ;;  %v710_v16 = vadd.f32 %v2167_v43, %v2166_v37  ;;  %v5956_v43 = vld [vmem:[#allocation37_spill] sm:$0xff] }
  0x56   :  { %v4090_v44 = vadd.f32 %v5950_v39, %v5949_v25  ;;  %v5952_v60 = vunpack.c.h.bf16 %v3860_v54  ;;  %v5955_v24 = vunpack.c.l.bf16 %v5954_v59  ;;  %v421_v32 = vmul.f32 0.0052083335, %v3937_v35  ;;  %v5958_v39 = vld [vmem:[#allocation38_spill] sm:$0xff] }
  0x57   :  { %v2169_v10 = vsel %vm563_vm3, 1.0, %v5767_v11  ;;  %v469_v46 = vfloor.f32 %v419_v52  ;;  %v4108_v21 = vmin.f32 %v467_v28, 3.0  ;;  %vm565_vm5 = vcmp.eq.f32.partialorder %v4079_v15, 0.0 }
  0x58   :  { %v4099_v8 = vadd.f32 %v5952_v60, %v5951_v63  ;;  %v4104_v41 = vadd.f32 %v5955_v24, %v5953_v30  ;;  %v711_v37 = vadd.f32 %v2168_v5, %v710_v16  ;;  %v5957_v54 = vunpack.c.h.bf16 %v5954_v59  ;;  %v5960_v30 = vld [vmem:[#allocation39_spill] sm:$0xff]  ;;  %v5962_v16 = vld [vmem:[#allocation40_spill] sm:$0xff] }
  0x59   :  { %v5959_v63 = vunpack.c.l.bf16 %v3874_v33  ;;  %v5961_v35 = vunpack.c.h.bf16 %v3874_v33  ;;  %v2170_v52 = vsel %vm564_vm4, 1.0, %v5767_v11  ;;  %v470_v28 = vfloor.f32 %v420_v7 }
  0x5a   :  { %v4114_v25 = vadd.f32 %v5957_v54, %v5956_v43  ;;  %v4127_v23 = vmin.f32 %v468_v12, 3.0  ;;  %vm566_vm6 = vcmp.eq.f32.partialorder %v4093_v40, 0.0  ;;  %v712_v5 = vadd.f32 %v2169_v10, %v711_v37  ;;  %v5966_v10 = vld [vmem:[#allocation42_spill] sm:$0xff] }
  0x5b   :  { %v4119_v60 = vadd.f32 %v5959_v63, %v5958_v39  ;;  %v4124_v24 = vadd.f32 %v5961_v35, %v5960_v30  ;;  %v5963_v59 = vunpack.c.l.bf16 %v3881_v45  ;;  %v422_v54 = vmul.f32 0.0052083335, %v3942_v22  ;;  %v5964_v63 = vld [vmem:[#allocation41_spill] sm:$0xff] }
  0x5c   :  { %v471_v39 = vfloor.f32 %v421_v32  ;;  %v2171_v33 = vsel %vm565_vm5, 1.0, %v5767_v11  ;;  %v5965_v30 = vunpack.c.h.bf16 %v3881_v45  ;;  %v4142_v7 = vmin.f32 %v469_v46, 3.0 }
  0x5d   :  { %v4133_v43 = vadd.f32 %v5963_v59, %v5962_v16  ;;  %vm567_vm7 = vcmp.eq.f32.partialorder %v4108_v21, 0.0  ;;  %v713_v12 = vadd.f32 %v2170_v52, %v712_v5  ;;  %v5967_v37 = vunpack.c.l.bf16 %v3886_v26 }
  0x5e   :  { %v4140_v35 = vadd.f32 %v5965_v30, %v5964_v63  ;;  %v2172_v22 = vsel %vm566_vm6, 1.0, %v5767_v11  ;;  %vm765_vm8 = vcmp.eq.f32.partialorder %v3999_v1, 1.0  ;;  %vm766_vm9 = vcmp.eq.f32.partialorder %v4001_v31, 1.0 }
  0x5f   :  { %v4148_v16 = vadd.f32 %v5967_v37, %v5966_v10  ;;  %v423_v45 = vmul.f32 0.0052083335, %v3947_v55  ;;  %v4154_v32 = vmin.f32 %v470_v28, 3.0  ;;  %vm568_vm10 = vcmp.eq.f32.partialorder %v4127_v23, 0.0  ;;  %v5970_v55 = vld [vmem:[#allocation43_spill] sm:$0xff] }
  0x60   :  { %v714_v46 = vadd.f32 %v2171_v33, %v713_v12  ;;  %v472_v59 = vfloor.f32 %v422_v54  ;;  %v4157_v52 = vmin.f32 %v471_v39, 3.0  ;;  %v2173_v5 = vsel %vm567_vm7, 1.0, %v5767_v11  ;;  %v5973_v33 = vld [vmem:[#allocation44_spill] sm:$0xff] }
  0x61   :  { %5968 = vst [vmem:[#allocation28_spill] sm:$0xff] %v4148_v16  ;;  %vm767_vm11 = vcmp.eq.f32.partialorder %v4028_v57, 1.0  ;;  %vm569_vm12 = vcmp.eq.f32.partialorder %v4142_v7, 0.0  ;;  %v2216_v30 = vsel %vm765_vm8, 1.0, %v5767_v11  ;;  %v2217_v10 = vsel %vm766_vm9, 1.0, %v5767_v11 }
  0x62   :  { %5969 = vst [vmem:[#allocation46_spill] sm:$0xff] %v4154_v32  ;;  %v715_v63 = vadd.f32 %v2172_v22, %v714_v46  ;;  %v5971_v28 = vunpack.c.h.bf16 %v3886_v26  ;;  %v4172_v54 = vadd.f32 %v2814_v9, %v5973_v33  ;;  %v2174_v39 = vsel %vm568_vm10, 1.0, %v5767_v11 }
  0x63   :  { %vm768_vm13 = vcmp.eq.f32.partialorder %v4040_v4, 1.0  ;;  %v424_v12 = vmul.f32 0.0052083335, %v3952_v17  ;;  %vm570_vm14 = vcmp.eq.f32.partialorder %v4154_v32, 0.0  ;;  %v2218_v46 = vsel %vm767_vm11, 1.0, %v5767_v11 }
  0x64   :  { %v4167_v37 = vadd.f32 %v5971_v28, %v5970_v55  ;;  %5974 = vst [vmem:[#allocation30_spill] sm:$0xff] %v4172_v54  ;;  %v716_v22 = vadd.f32 %v2173_v5, %v715_v63  ;;  %v473_v16 = vfloor.f32 %v423_v45  ;;  %v2175_v26 = vsel %vm569_vm12, 1.0, %v5767_v11  ;;  %v5976_v54 = vld [vmem:[#allocation45_spill] sm:$0xff] }
  0x65   :  { %vm769_vm15 = vcmp.eq.f32.partialorder %v4064_v14, 1.0  ;;  %v915_v55 = vadd.f32 %v2217_v10, %v2216_v30  ;;  %v4181_v28 = vmin.f32 %v472_v59, 3.0  ;;  %vm571_vm0 = vcmp.eq.f32.partialorder %v4157_v52, 0.0 }
  0x66   :  { %5972 = vst [vmem:[#allocation29_spill] sm:$0xff] %v4167_v37  ;;  %v717_v9 = vadd.f32 %v2174_v39, %v716_v22  ;;  %v2219_v33 = vsel %vm768_vm13, 1.0, %v5767_v11  ;;  %v5977_v17 = vunpack.c.h.bf16 %v3900_v34  ;;  %v2176_v5 = vsel %vm570_vm14, 1.0, %v5767_v11 }
  0x67   :  { %5975 = vst [vmem:[#allocation47_spill] sm:$0xff] %v4181_v28  ;;  %vm770_vm1 = vcmp.eq.f32.partialorder %v4079_v15, 1.0  ;;  %v916_v45 = vadd.f32 %v2218_v46, %v915_v55  ;;  %v425_v63 = vmul.f32 0.0052083335, %v3957_v53  ;;  %v426_v59 = vmul.f32 0.0052083335, %v3962_v51 }
  0x68   :  { %v4188_v37 = vadd.f32 %v5977_v17, %v5976_v54  ;;  %v718_v30 = vadd.f32 %v2175_v26, %v717_v9  ;;  %v2220_v10 = vsel %vm769_vm15, 1.0, %v5767_v11  ;;  %v474_v39 = vfloor.f32 %v424_v12 }
  0x69   :  { %v2177_v22 = vsel %vm571_vm0, 1.0, %v5767_v11  ;;  %vm771_vm2 = vcmp.eq.f32.partialorder %v4093_v40, 1.0  ;;  %v917_v34 = vadd.f32 %v2219_v33, %v916_v45  ;;  %v4197_v54 = vmin.f32 %v473_v16, 3.0 }
  0x6a   :  { %vm572_vm3 = vcmp.eq.f32.partialorder %v4181_v28, 0.0  ;;  %v719_v17 = vadd.f32 %v2176_v5, %v718_v30  ;;  %v2221_v46 = vsel %vm770_vm1, 1.0, %v5767_v11  ;;  %v427_v53 = vmul.f32 0.0052083335, %v3967_v13 }
  0x6b   :  { %5978 = vst [vmem:[#allocation31_spill] sm:$0xff] %v4197_v54  ;;  %v4203_v51 = vmul.f32 0.0052083335, %v3972_v18  ;;  %vm772_vm4 = vcmp.eq.f32.partialorder %v4108_v21, 1.0  ;;  %v918_v12 = vadd.f32 %v2220_v10, %v917_v34  ;;  %v4207_v26 = vmul.f32 0.0052083335, %v3977_v62 }
  0x6c   :  { %v4210_v55 = vmul.f32 0.0052083335, %v3982_v0  ;;  %v720_v16 = vadd.f32 %v2177_v22, %v719_v17  ;;  %v2222_v9 = vsel %vm771_vm2, 1.0, %v5767_v11  ;;  %v4214_v33 = vmul.f32 0.0052083335, %v3987_v47 }
  0x6d   :  { %v2178_v13 = vsel %vm572_vm3, 1.0, %v5767_v11  ;;  %vm773_vm5 = vcmp.eq.f32.partialorder %v4127_v23, 1.0  ;;  %v919_v18 = vadd.f32 %v2221_v46, %v918_v12  ;;  %v475_v5 = vfloor.f32 %v425_v63 }
  0x6e   :  { %v4218_v45 = vmin.f32 %v474_v39, 3.0  ;;  %vm573_vm6 = vcmp.eq.f32.partialorder %v4197_v54, 0.0  ;;  %v2223_v62 = vsel %vm772_vm4, 1.0, %v5767_v11  ;;  %v4223_v0 = vmul.f32 0.0052083335, %v3992_v20 }
  0x6f   :  { %v4226_v30 = vmul.f32 0.0052083335, %v3997_v38  ;;  %vm774_vm7 = vcmp.eq.f32.partialorder %v4142_v7, 1.0  ;;  %v920_v47 = vadd.f32 %v2222_v9, %v919_v18  ;;  %v4230_v10 = vmul.f32 0.0052083335, %v4006_v48 }
  0x70   :  { %5979 = vst [vmem:[#allocation32_spill] sm:$0xff] %v4218_v45  ;;  %v4233_v63 = vmul.f32 0.0052083335, %v4011_v6  ;;  %v721_v39 = vadd.f32 %v2178_v13, %v720_v16  ;;  %v2224_v22 = vsel %vm773_vm5, 1.0, %v5767_v11  ;;  %v4237_v34 = vmul.f32 0.0052083335, %v4016_v36 }
  0x71   :  { %v2179_v20 = vsel %vm573_vm6, 1.0, %v5767_v11  ;;  %vm775_vm8 = vcmp.eq.f32.partialorder %v4154_v32, 1.0  ;;  %v921_v38 = vadd.f32 %v2223_v62, %v920_v47  ;;  %v476_v17 = vfloor.f32 %v426_v59 }
  0x72   :  { %v4241_v46 = vmin.f32 %v475_v5, 3.0  ;;  %vm574_vm9 = vcmp.eq.f32.partialorder %v4218_v45, 0.0  ;;  %v2225_v48 = vsel %vm774_vm7, 1.0, %v5767_v11  ;;  %v4246_v6 = vmul.f32 0.0052083335, %v4021_v2 }
  0x73   :  { %v4249_v12 = vmul.f32 0.0052083335, %v4026_v19  ;;  %vm776_vm10 = vcmp.eq.f32.partialorder %v4157_v52, 1.0  ;;  %v922_v36 = vadd.f32 %v2224_v22, %v921_v38  ;;  %v4253_v16 = vmul.f32 0.0052083335, %v4033_v3 }
  0x74   :  { %5980 = vst [vmem:[#allocation33_spill] sm:$0xff] %v4241_v46  ;;  %v4256_v59 = vmul.f32 0.0052083335, %v4038_v42  ;;  %v722_v9 = vadd.f32 %v2179_v20, %v721_v39  ;;  %v2226_v13 = vsel %vm775_vm8, 1.0, %v5767_v11  ;;  %v4260_v18 = vmul.f32 0.0052083335, %v4047_v29 }
  0x75   :  { %v2180_v2 = vsel %vm574_vm9, 1.0, %v5767_v11  ;;  %vm777_vm11 = vcmp.eq.f32.partialorder %v4181_v28, 1.0  ;;  %v923_v19 = vadd.f32 %v2225_v48, %v922_v36  ;;  %v477_v5 = vfloor.f32 %v427_v53 }
  0x76   :  { %v4264_v62 = vmin.f32 %v476_v17, 3.0  ;;  %vm575_vm12 = vcmp.eq.f32.partialorder %v4241_v46, 0.0  ;;  %v2227_v3 = vsel %vm776_vm10, 1.0, %v5767_v11  ;;  %v4269_v42 = vmul.f32 0.0052083335, %v4052_v49 }
  0x77   :  { %v4272_v47 = vmul.f32 0.0052083335, %v4057_v58  ;;  %vm778_vm13 = vcmp.eq.f32.partialorder %v4197_v54, 1.0  ;;  %v924_v29 = vadd.f32 %v2226_v13, %v923_v19  ;;  %v4276_v39 = vmul.f32 0.0052083335, %v4062_v50 }
  0x78   :  { %v4279_v53 = vmul.f32 0.0052083335, %v4070_v27  ;;  %v723_v22 = vadd.f32 %v2180_v2, %v722_v9  ;;  %v2228_v20 = vsel %vm777_vm11, 1.0, %v5767_v11  ;;  %v478_v38 = vfloor.f32 %v4203_v51 }
  0x79   :  { %v2181_v49 = vsel %vm575_vm12, 1.0, %v5767_v11  ;;  %vm779_vm14 = vcmp.eq.f32.partialorder %v4218_v45, 1.0  ;;  %v925_v58 = vadd.f32 %v2227_v3, %v924_v29  ;;  %v4286_v17 = vmul.f32 0.0052083335, %v4075_v56 }
  0x7a   :  { %v4288_v48 = vmin.f32 %v477_v5, 3.0  ;;  %vm576_vm15 = vcmp.eq.f32.partialorder %v4264_v62, 0.0  ;;  %v2229_v50 = vsel %vm778_vm13, 1.0, %v5767_v11  ;;  %v4293_v27 = vmul.f32 0.0052083335, %v4085_v61 }
  0x7b   :  { %v479_v36 = vfloor.f32 %v4207_v26  ;;  %vm780_vm0 = vcmp.eq.f32.partialorder %v4241_v46, 1.0  ;;  %v926_v51 = vadd.f32 %v2228_v20, %v925_v58  ;;  %v724_v9 = vadd.f32 %v2181_v49, %v723_v22 }
  0x7c   :  { %v2230_v13 = vsel %vm779_vm14, 1.0, %v5767_v11  ;;  %vm973_vm1 = vcmp.eq.f32.partialorder %v3999_v1, 2.0  ;;  %vm974_vm2 = vcmp.eq.f32.partialorder %v4001_v31, 2.0  ;;  %v4300_v56 = vmin.f32 %v478_v38, 3.0 }
  0x7d   :  { %v2182_v2 = vsel %vm576_vm15, 1.0, %v5767_v11  ;;  %vm781_vm3 = vcmp.eq.f32.partialorder %v4264_v62, 1.0  ;;  %v927_v61 = vadd.f32 %v2229_v50, %v926_v51  ;;  %v480_v19 = vfloor.f32 %v4210_v55 }
  0x7e   :  { %5981 = vst [vmem:[#allocation34_spill] sm:$0xff] %v4300_v56  ;;  %vm577_vm4 = vcmp.eq.f32.partialorder %v4288_v48, 0.0  ;;  %v2231_v26 = vsel %vm780_vm0, 1.0, %v5767_v11  ;;  %vm975_vm5 = vcmp.eq.f32.partialorder %v4028_v57, 2.0  ;;  %vm782_vm6 = vcmp.eq.f32.partialorder %v4288_v48, 1.0 }
  0x7f   :  { %v928_v5 = vadd.f32 %v2230_v13, %v927_v61  ;;  %v2266_v3 = vsel %vm973_vm1, 1.0, %v5767_v11  ;;  %v2267_v29 = vsel %vm974_vm2, 1.0, %v5767_v11  ;;  %v4311_v22 = vmin.f32 %v479_v36, 3.0 }
  0x80   :  { %v725_v20 = vadd.f32 %v2182_v2, %v724_v9  ;;  %v2232_v38 = vsel %vm781_vm3, 1.0, %v5767_v11  ;;  %vm976_vm7 = vcmp.eq.f32.partialorder %v4040_v4, 2.0  ;;  %vm578_vm8 = vcmp.eq.f32.partialorder %v4300_v56, 0.0 }
  0x81   :  { %v2183_v55 = vsel %vm577_vm4, 1.0, %v5767_v11  ;;  %v929_v49 = vadd.f32 %v2231_v26, %v928_v5  ;;  %v2268_v58 = vsel %vm975_vm5, 1.0, %v5767_v11  ;;  %vm783_vm9 = vcmp.eq.f32.partialorder %v4300_v56, 1.0 }
  0x82   :  { %v2233_v50 = vsel %vm782_vm6, 1.0, %v5767_v11  ;;  %vm977_vm10 = vcmp.eq.f32.partialorder %v4064_v14, 2.0  ;;  %v1123_v36 = vadd.f32 %v2267_v29, %v2266_v3  ;;  %v4322_v51 = vmul.f32 0.0052083335, %v4090_v44 }
  0x83   :  { %v481_v9 = vfloor.f32 %v4214_v33  ;;  %v930_v13 = vadd.f32 %v2232_v38, %v929_v49  ;;  %v2269_v2 = vsel %vm976_vm7, 1.0, %v5767_v11  ;;  %v4326_v61 = vmin.f32 %v480_v19, 3.0 }
  0x84   :  { %v726_v26 = vadd.f32 %v2183_v55, %v725_v20  ;;  %vm978_vm11 = vcmp.eq.f32.partialorder %v4079_v15, 2.0  ;;  %v1124_v5 = vadd.f32 %v2268_v58, %v1123_v36  ;;  %v2184_v4 = vsel %vm578_vm8, 1.0, %v5767_v11 }
  0x85   :  { %v2234_v3 = vsel %vm783_vm9, 1.0, %v5767_v11  ;;  %v931_v29 = vadd.f32 %v2233_v50, %v930_v13  ;;  %v2270_v44 = vsel %vm977_vm10, 1.0, %v5767_v11  ;;  %vm579_vm12 = vcmp.eq.f32.partialorder %v4311_v22, 0.0 }
  0x86   :  { %vm784_vm13 = vcmp.eq.f32.partialorder %v4311_v22, 1.0  ;;  %vm979_vm14 = vcmp.eq.f32.partialorder %v4093_v40, 2.0  ;;  %v1125_v33 = vadd.f32 %v2269_v2, %v1124_v5  ;;  %v4338_v19 = vmul.f32 0.0052083335, %v4099_v8 }
  0x87   :  { %v4341_v20 = vmul.f32 0.0052083335, %v4104_v41  ;;  %v482_v38 = vfloor.f32 %v4223_v0  ;;  %v2271_v55 = vsel %vm978_vm11, 1.0, %v5767_v11  ;;  %v727_v49 = vadd.f32 %v2184_v4, %v726_v26 }
  0x88   :  { %v932_v58 = vadd.f32 %v2234_v3, %v931_v29  ;;  %vm980_vm15 = vcmp.eq.f32.partialorder %v4108_v21, 2.0  ;;  %v1126_v50 = vadd.f32 %v2270_v44, %v1125_v33  ;;  %v4346_v36 = vmin.f32 %v481_v9, 3.0 }
  0x89   :  { %v2185_v13 = vsel %vm579_vm12, 1.0, %v5767_v11  ;;  %v2235_v2 = vsel %vm784_vm13, 1.0, %v5767_v11  ;;  %v2272_v8 = vsel %vm979_vm14, 1.0, %v5767_v11  ;;  %vm580_vm0 = vcmp.eq.f32.partialorder %v4326_v61, 0.0 }
  0x8a   :  { %vm785_vm1 = vcmp.eq.f32.partialorder %v4326_v61, 1.0  ;;  %vm981_vm2 = vcmp.eq.f32.partialorder %v4127_v23, 2.0  ;;  %v1127_v41 = vadd.f32 %v2271_v55, %v1126_v50  ;;  %v4355_v4 = vmul.f32 0.0052083335, %v4114_v25 }
  0x8b   :  { %v4358_v0 = vmul.f32 0.0052083335, %v4119_v60  ;;  %v483_v9 = vfloor.f32 %v4226_v30  ;;  %v2273_v26 = vsel %vm980_vm15, 1.0, %v5767_v11  ;;  %v728_v5 = vadd.f32 %v2185_v13, %v727_v49 }
  0x8c   :  { %v933_v3 = vadd.f32 %v2235_v2, %v932_v58  ;;  %vm982_vm3 = vcmp.eq.f32.partialorder %v4142_v7, 2.0  ;;  %v1128_v29 = vadd.f32 %v2272_v8, %v1127_v41  ;;  %v4363_v44 = vmin.f32 %v482_v38, 3.0 }
  0x8d   :  { %v2186_v33 = vsel %vm580_vm0, 1.0, %v5767_v11  ;;  %v2236_v55 = vsel %vm785_vm1, 1.0, %v5767_v11  ;;  %v2274_v25 = vsel %vm981_vm2, 1.0, %v5767_v11  ;;  %vm581_vm4 = vcmp.eq.f32.partialorder %v4346_v36, 0.0 }
  0x8e   :  { %vm786_vm5 = vcmp.eq.f32.partialorder %v4346_v36, 1.0  ;;  %vm983_vm6 = vcmp.eq.f32.partialorder %v4154_v32, 2.0  ;;  %v1129_v60 = vadd.f32 %v2273_v26, %v1128_v29  ;;  %v4372_v30 = vmul.f32 0.0052083335, %v4124_v24 }
  0x8f   :  { %v4375_v49 = vmul.f32 0.0052083335, %v4133_v43  ;;  %v484_v38 = vfloor.f32 %v4230_v10  ;;  %v2275_v58 = vsel %vm982_vm3, 1.0, %v5767_v11  ;;  %v729_v50 = vadd.f32 %v2186_v33, %v728_v5  ;;  %v5982_v5 = vld [vmem:[#allocation28_spill] sm:$0xff] }
  0x90   :  { %v934_v13 = vadd.f32 %v2236_v55, %v933_v3  ;;  %vm984_vm7 = vcmp.eq.f32.partialorder %v4157_v52, 2.0  ;;  %v1130_v2 = vadd.f32 %v2274_v25, %v1129_v60  ;;  %v4380_v8 = vmin.f32 %v483_v9, 3.0 }
  0x91   :  { %v2187_v41 = vsel %vm581_vm4, 1.0, %v5767_v11  ;;  %v2237_v26 = vsel %vm786_vm5, 1.0, %v5767_v11  ;;  %v2276_v24 = vsel %vm983_vm6, 1.0, %v5767_v11  ;;  %vm582_vm8 = vcmp.eq.f32.partialorder %v4363_v44, 0.0 }
  0x92   :  { %vm787_vm9 = vcmp.eq.f32.partialorder %v4363_v44, 1.0  ;;  %vm985_vm10 = vcmp.eq.f32.partialorder %v4181_v28, 2.0  ;;  %v1131_v43 = vadd.f32 %v2275_v58, %v1130_v2  ;;  %v4389_v10 = vmul.f32 0.0052083335, %v4140_v35  ;;  %v5984_v2 = vld [vmem:[#allocation30_spill] sm:$0xff] }
  0x93   :  { %v4392_v3 = vmul.f32 0.0052083335, %v5982_v5  ;;  %v485_v9 = vfloor.f32 %v4233_v63  ;;  %v2277_v29 = vsel %vm984_vm7, 1.0, %v5767_v11  ;;  %v730_v33 = vadd.f32 %v2187_v41, %v729_v50  ;;  %v5983_v50 = vld [vmem:[#allocation29_spill] sm:$0xff] }
  0x94   :  { %v935_v55 = vadd.f32 %v2237_v26, %v934_v13  ;;  %vm986_vm11 = vcmp.eq.f32.partialorder %v4197_v54, 2.0  ;;  %v1132_v25 = vadd.f32 %v2276_v24, %v1131_v43  ;;  %v4397_v60 = vmin.f32 %v484_v38, 3.0 }
  0x95   :  { %v2188_v28 = vsel %vm582_vm8, 1.0, %v5767_v11  ;;  %v2238_v58 = vsel %vm787_vm9, 1.0, %v5767_v11  ;;  %v2278_v35 = vsel %vm985_vm10, 1.0, %v5767_v11  ;;  %vm583_vm12 = vcmp.eq.f32.partialorder %v4380_v8, 0.0 }
  0x96   :  { %vm788_vm13 = vcmp.eq.f32.partialorder %v4380_v8, 1.0  ;;  %vm987_vm14 = vcmp.eq.f32.partialorder %v4218_v45, 2.0  ;;  %v1133_v63 = vadd.f32 %v2277_v29, %v1132_v25  ;;  %v4406_v13 = vmul.f32 0.0052083335, %v5983_v50 }
  0x97   :  { %v4409_v41 = vmul.f32 0.0052083335, %v5984_v2  ;;  %v486_v38 = vfloor.f32 %v4237_v34  ;;  %v2279_v26 = vsel %vm986_vm11, 1.0, %v5767_v11  ;;  %v731_v24 = vadd.f32 %v2188_v28, %v730_v33 }
  0x98   :  { %v936_v43 = vadd.f32 %v2238_v58, %v935_v55  ;;  %vm988_vm15 = vcmp.eq.f32.partialorder %v4241_v46, 2.0  ;;  %v1134_v5 = vadd.f32 %v2278_v35, %v1133_v63  ;;  %v4414_v54 = vmin.f32 %v485_v9, 3.0 }
  0x99   :  { %v2189_v45 = vsel %vm583_vm12, 1.0, %v5767_v11  ;;  %v2239_v29 = vsel %vm788_vm13, 1.0, %v5767_v11  ;;  %v2280_v25 = vsel %vm987_vm14, 1.0, %v5767_v11  ;;  %vm584_vm0 = vcmp.eq.f32.partialorder %v4397_v60, 0.0 }
  0x9a   :  { %vm789_vm1 = vcmp.eq.f32.partialorder %v4397_v60, 1.0  ;;  %vm989_vm2 = vcmp.eq.f32.partialorder %v4264_v62, 2.0  ;;  %v1135_v34 = vadd.f32 %v2279_v26, %v1134_v5  ;;  %v4423_v28 = vmul.f32 0.0052083335, %v4188_v37 }
  0x9b   :  { %v487_v33 = vfloor.f32 %v4246_v6  ;;  %v488_v9 = vfloor.f32 %v4249_v12  ;;  %v2281_v55 = vsel %vm988_vm15, 1.0, %v5767_v11  ;;  %v732_v58 = vadd.f32 %v2189_v45, %v731_v24 }
  0x9c   :  { %v937_v35 = vadd.f32 %v2239_v29, %v936_v43  ;;  %vm990_vm3 = vcmp.eq.f32.partialorder %v4288_v48, 2.0  ;;  %v1136_v63 = vadd.f32 %v2280_v25, %v1135_v34  ;;  %v4429_v50 = vmin.f32 %v486_v38, 3.0 }
  0x9d   :  { %v2190_v2 = vsel %vm584_vm0, 1.0, %v5767_v11  ;;  %v2240_v26 = vsel %vm789_vm1, 1.0, %v5767_v11  ;;  %v2282_v37 = vsel %vm989_vm2, 1.0, %v5767_v11  ;;  %vm585_vm4 = vcmp.eq.f32.partialorder %v4414_v54, 0.0 }
  0x9e   :  { %vm790_vm5 = vcmp.eq.f32.partialorder %v4414_v54, 1.0  ;;  %vm991_vm6 = vcmp.eq.f32.partialorder %v4300_v56, 2.0  ;;  %v1137_v6 = vadd.f32 %v2281_v55, %v1136_v63  ;;  %v489_v45 = vfloor.f32 %v4253_v16 }
  0x9f   :  { %v490_v12 = vfloor.f32 %v4256_v59  ;;  %v2283_v24 = vsel %vm990_vm3, 1.0, %v5767_v11  ;;  %v733_v43 = vadd.f32 %v2190_v2, %v732_v58  ;;  %v938_v5 = vadd.f32 %v2240_v26, %v937_v35 }
  0xa0   :  { %vm992_vm7 = vcmp.eq.f32.partialorder %v4311_v22, 2.0  ;;  %v1138_v29 = vadd.f32 %v2282_v37, %v1137_v6  ;;  %v4442_v25 = vmin.f32 %v487_v33, 3.0  ;;  %v2191_v34 = vsel %vm585_vm4, 1.0, %v5767_v11 }
  0xa1   :  { %v2241_v56 = vsel %vm790_vm5, 1.0, %v5767_v11  ;;  %v2284_v55 = vsel %vm991_vm6, 1.0, %v5767_v11  ;;  %vm586_vm8 = vcmp.eq.f32.partialorder %v4429_v50, 0.0  ;;  %vm791_vm9 = vcmp.eq.f32.partialorder %v4429_v50, 1.0 }
  0xa2   :  { %vm993_vm10 = vcmp.eq.f32.partialorder %v4326_v61, 2.0  ;;  %v1139_v16 = vadd.f32 %v2283_v24, %v1138_v29  ;;  %v492_v59 = vfloor.f32 %v4269_v42  ;;  %v2285_v35 = vsel %vm992_vm7, 1.0, %v5767_v11 }
  0xa3   :  { %v734_v63 = vadd.f32 %v2191_v34, %v733_v43  ;;  %v939_v2 = vadd.f32 %v2241_v56, %v938_v5  ;;  %vm994_vm11 = vcmp.eq.f32.partialorder %v4346_v36, 2.0  ;;  %v4455_v37 = vmin.f32 %v488_v9, 3.0 }
  0xa4   :  { %v1140_v26 = vadd.f32 %v2284_v55, %v1139_v16  ;;  %v2192_v6 = vsel %vm586_vm8, 1.0, %v5767_v11  ;;  %v2242_v38 = vsel %vm791_vm9, 1.0, %v5767_v11  ;;  %v2286_v24 = vsel %vm993_vm10, 1.0, %v5767_v11 }
  0xa5   :  { %vm587_vm12 = vcmp.eq.f32.partialorder %v4442_v25, 0.0  ;;  %vm792_vm13 = vcmp.eq.f32.partialorder %v4442_v25, 1.0  ;;  %vm995_vm14 = vcmp.eq.f32.partialorder %v4363_v44, 2.0  ;;  %v2287_v5 = vsel %vm994_vm11, 1.0, %v5767_v11 }
  0xa6   :  { %v1141_v42 = vadd.f32 %v2285_v35, %v1140_v26  ;;  %v735_v29 = vadd.f32 %v2192_v6, %v734_v63  ;;  %v940_v34 = vadd.f32 %v2242_v38, %v939_v2  ;;  %vm996_vm15 = vcmp.eq.f32.partialorder %v4380_v8, 2.0 }
  0xa7   :  { %v4468_v16 = vmin.f32 %v489_v45, 3.0  ;;  %v2193_v33 = vsel %vm587_vm12, 1.0, %v5767_v11  ;;  %v2243_v58 = vsel %vm792_vm13, 1.0, %v5767_v11  ;;  %v2288_v35 = vsel %vm995_vm14, 1.0, %v5767_v11 }
  0xa8   :  { %v1142_v55 = vadd.f32 %v2286_v24, %v1141_v42  ;;  %vm588_vm0 = vcmp.eq.f32.partialorder %v4455_v37, 0.0  ;;  %vm793_vm1 = vcmp.eq.f32.partialorder %v4455_v37, 1.0  ;;  %vm997_vm2 = vcmp.eq.f32.partialorder %v4397_v60, 2.0 }
  0xa9   :  { %v2289_v2 = vsel %vm996_vm15, 1.0, %v5767_v11  ;;  %v736_v6 = vadd.f32 %v2193_v33, %v735_v29  ;;  %v941_v24 = vadd.f32 %v2243_v58, %v940_v34  ;;  %vm998_vm3 = vcmp.eq.f32.partialorder %v4414_v54, 2.0 }
  0xaa   :  { %v1143_v26 = vadd.f32 %v2287_v5, %v1142_v55  ;;  %v4481_v9 = vmin.f32 %v490_v12, 3.0  ;;  %v2194_v43 = vsel %vm588_vm0, 1.0, %v5767_v11  ;;  %v2244_v56 = vsel %vm793_vm1, 1.0, %v5767_v11 }
  0xab   :  { %v2290_v5 = vsel %vm997_vm2, 1.0, %v5767_v11  ;;  %vm589_vm4 = vcmp.eq.f32.partialorder %v4468_v16, 0.0  ;;  %vm794_vm5 = vcmp.eq.f32.partialorder %v4468_v16, 1.0  ;;  %vm999_vm6 = vcmp.eq.f32.partialorder %v4429_v50, 2.0 }
  0xac   :  { %v1144_v42 = vadd.f32 %v2288_v35, %v1143_v26  ;;  %v5985_v12 = vfloor.f32 %v4260_v18  ;;  %v2291_v34 = vsel %vm998_vm3, 1.0, %v5767_v11  ;;  %v737_v35 = vadd.f32 %v2194_v43, %v736_v6 }
  0xad   :  { %v942_v26 = vadd.f32 %v2244_v56, %v941_v24  ;;  %vm1000_vm7 = vcmp.eq.f32.partialorder %v4442_v25, 2.0  ;;  %v4497_v63 = vmin.f32 %v492_v59, 3.0  ;;  %v2195_v38 = vsel %vm589_vm4, 1.0, %v5767_v11 }
  0xae   :  { %v1145_v55 = vadd.f32 %v2289_v2, %v1144_v42  ;;  %v4493_v29 = vmin.f32 %v5985_v12, 3.0  ;;  %v2245_v2 = vsel %vm794_vm5, 1.0, %v5767_v11  ;;  %v2292_v42 = vsel %vm999_vm6, 1.0, %v5767_v11 }
  0xaf   :  { %vm590_vm8 = vcmp.eq.f32.partialorder %v4481_v9, 0.0  ;;  %vm795_vm9 = vcmp.eq.f32.partialorder %v4481_v9, 1.0  ;;  %vm1001_vm10 = vcmp.eq.f32.partialorder %v4455_v37, 2.0  ;;  %v2293_v56 = vsel %vm1000_vm7, 1.0, %v5767_v11 }
  0xb0   :  { %v1146_v45 = vadd.f32 %v2290_v5, %v1145_v55  ;;  %vm591_vm11 = vcmp.eq.f32.partialorder %v4493_v29, 0.0  ;;  %vm1181_vm12 = vcmp.eq.f32.partialorder %v3999_v1, 3.0  ;;  %vm1182_vm13 = vcmp.eq.f32.partialorder %v4001_v31, 3.0 }
  0xb1   :  { %v738_v59 = vadd.f32 %v2195_v38, %v737_v35  ;;  %v943_v43 = vadd.f32 %v2245_v2, %v942_v26  ;;  %vm1002_vm14 = vcmp.eq.f32.partialorder %v4468_v16, 2.0  ;;  %v2196_v24 = vsel %vm590_vm8, 1.0, %v5767_v11  ;;  %v5987_v2 = vld [vmem:[#allocation49_spill] sm:$0xff] }
  0xb2   :  { %v1147_v18 = vadd.f32 %v2291_v34, %v1146_v45  ;;  %v2246_v5 = vsel %vm795_vm9, 1.0, %v5767_v11  ;;  %v2294_v55 = vsel %vm1001_vm10, 1.0, %v5767_v11  ;;  %vm1183_vm15 = vcmp.eq.f32.partialorder %v4028_v57, 3.0 }
  0xb3   :  { %vm796_vm0 = vcmp.eq.f32.partialorder %v4493_v29, 1.0  ;;  %v2316_v12 = vsel %vm1181_vm12, 1.0, %v5767_v11  ;;  %v2317_v34 = vsel %vm1182_vm13, 1.0, %v5767_v11  ;;  %v5986_v38 = vfloor.f32 %v4272_v47 }
  0xb4   :  { %v1148_v6 = vadd.f32 %v2292_v42, %v1147_v18  ;;  %vm1003_vm1 = vcmp.eq.f32.partialorder %v4481_v9, 2.0  ;;  %v2295_v26 = vsel %vm1002_vm14, 1.0, %v5767_v11  ;;  %vm1184_vm2 = vcmp.eq.f32.partialorder %v5987_v2, 3.0 }
  0xb5   :  { %v4519_v35 = vmin.f32 %v5986_v38, 3.0  ;;  %v739_v42 = vadd.f32 %v2196_v24, %v738_v59  ;;  %v944_v18 = vadd.f32 %v2246_v5, %v943_v43  ;;  %v2318_v58 = vsel %vm1183_vm15, 1.0, %v5767_v11 }
  0xb6   :  { %v1149_v45 = vadd.f32 %v2293_v56, %v1148_v6  ;;  %v2197_v56 = vsel %vm591_vm11, 1.0, %v5767_v11  ;;  %v2247_v6 = vsel %vm796_vm0, 1.0, %v5767_v11  ;;  %vm1185_vm3 = vcmp.eq.f32.partialorder %v4064_v14, 3.0 }
  0xb7   :  { %v1331_v47 = vadd.f32 %v2317_v34, %v2316_v12  ;;  %vm592_vm4 = vcmp.eq.f32.partialorder %v4497_v63, 0.0  ;;  %vm797_vm5 = vcmp.eq.f32.partialorder %v4497_v63, 1.0  ;;  %v2319_v59 = vsel %vm1184_vm2, 1.0, %v5767_v11 }
  0xb8   :  { %v1150_v33 = vadd.f32 %v2294_v55, %v1149_v45  ;;  %v5988_v43 = vfloor.f32 %v4276_v39  ;;  %v2296_v5 = vsel %vm1003_vm1, 1.0, %v5767_v11  ;;  %vm1186_vm6 = vcmp.eq.f32.partialorder %v4079_v15, 3.0 }
  0xb9   :  { %v1332_v55 = vadd.f32 %v2318_v58, %v1331_v47  ;;  %v740_v45 = vadd.f32 %v2197_v56, %v739_v42  ;;  %v945_v12 = vadd.f32 %v2247_v6, %v944_v18  ;;  %vm1004_vm7 = vcmp.eq.f32.partialorder %v4493_v29, 2.0 }
  0xba   :  { %v1151_v38 = vadd.f32 %v2295_v26, %v1150_v33  ;;  %v4535_v24 = vmin.f32 %v5988_v43, 3.0  ;;  %v2320_v34 = vsel %vm1185_vm3, 1.0, %v5767_v11  ;;  %v2198_v33 = vsel %vm592_vm4, 1.0, %v5767_v11 }
  0xbb   :  { %v2248_v26 = vsel %vm797_vm5, 1.0, %v5767_v11  ;;  %vm1187_vm8 = vcmp.eq.f32.partialorder %v4093_v40, 3.0  ;;  %v1333_v39 = vadd.f32 %v2319_v59, %v1332_v55  ;;  %vm593_vm9 = vcmp.eq.f32.partialorder %v4519_v35, 0.0 }
  0xbc   :  { %vm798_vm10 = vcmp.eq.f32.partialorder %v4519_v35, 1.0  ;;  %v1152_v43 = vadd.f32 %v2296_v5, %v1151_v38  ;;  %v2321_v58 = vsel %vm1186_vm6, 1.0, %v5767_v11  ;;  %v5989_v42 = vfloor.f32 %v4279_v53 }
  0xbd   :  { %v2297_v56 = vsel %vm1004_vm7, 1.0, %v5767_v11  ;;  %vm1188_vm11 = vcmp.eq.f32.partialorder %v4108_v21, 3.0  ;;  %v1334_v6 = vadd.f32 %v2320_v34, %v1333_v39  ;;  %v741_v47 = vadd.f32 %v2198_v33, %v740_v45 }
  0xbe   :  { %v4551_v18 = vmin.f32 %v5989_v42, 3.0  ;;  %v946_v15 = vadd.f32 %v2248_v26, %v945_v12  ;;  %vm1005_vm12 = vcmp.eq.f32.partialorder %v4497_v63, 2.0  ;;  %v2322_v59 = vsel %vm1187_vm8, 1.0, %v5767_v11 }
  0xbf   :  { %v2199_v55 = vsel %vm593_vm9, 1.0, %v5767_v11  ;;  %v2249_v38 = vsel %vm798_vm10, 1.0, %v5767_v11  ;;  %vm1189_vm13 = vcmp.eq.f32.partialorder %v4127_v23, 3.0  ;;  %v1335_v53 = vadd.f32 %v2321_v58, %v1334_v6 }
  0xc0   :  { %vm594_vm14 = vcmp.eq.f32.partialorder %v4535_v24, 0.0  ;;  %vm799_vm15 = vcmp.eq.f32.partialorder %v4535_v24, 1.0  ;;  %v1153_v5 = vadd.f32 %v2297_v56, %v1152_v43  ;;  %v2323_v34 = vsel %vm1188_vm11, 1.0, %v5767_v11 }
  0xc1   :  { %v5990_v45 = vfloor.f32 %v4286_v17  ;;  %v2298_v33 = vsel %vm1005_vm12, 1.0, %v5767_v11  ;;  %vm1190_vm0 = vcmp.eq.f32.partialorder %v4142_v7, 3.0  ;;  %v1336_v26 = vadd.f32 %v2322_v59, %v1335_v53 }
  0xc2   :  { %v742_v39 = vadd.f32 %v2199_v55, %v741_v47  ;;  %v947_v42 = vadd.f32 %v2249_v38, %v946_v15  ;;  %vm1006_vm1 = vcmp.eq.f32.partialorder %v4519_v35, 2.0  ;;  %v2324_v58 = vsel %vm1189_vm13, 1.0, %v5767_v11 }
  0xc3   :  { %v4565_v12 = vmin.f32 %v5990_v45, 3.0  ;;  %v2200_v6 = vsel %vm594_vm14, 1.0, %v5767_v11  ;;  %v2250_v43 = vsel %vm799_vm15, 1.0, %v5767_v11  ;;  %vm1191_vm2 = vcmp.eq.f32.partialorder %v4154_v32, 3.0 }
  0xc4   :  { %v1337_v17 = vadd.f32 %v2323_v34, %v1336_v26  ;;  %vm595_vm3 = vcmp.eq.f32.partialorder %v4551_v18, 0.0  ;;  %vm800_vm4 = vcmp.eq.f32.partialorder %v4551_v18, 1.0  ;;  %v1154_v56 = vadd.f32 %v2298_v33, %v1153_v5 }
  0xc5   :  { %5991 = vst [vmem:[#allocation35_spill] sm:$0xff] %v4565_v12  ;;  %v2325_v59 = vsel %vm1190_vm0, 1.0, %v5767_v11  ;;  %vm1007_vm5 = vcmp.eq.f32.partialorder %v4535_v24, 2.0  ;;  %v2299_v47 = vsel %vm1006_vm1, 1.0, %v5767_v11  ;;  %v743_v38 = vadd.f32 %v2200_v6, %v742_v39 }
  0xc6   :  { %v1338_v55 = vadd.f32 %v2324_v58, %v1337_v17  ;;  %v948_v53 = vadd.f32 %v2250_v43, %v947_v42  ;;  %vm1192_vm6 = vcmp.eq.f32.partialorder %v4157_v52, 3.0  ;;  %v2326_v34 = vsel %vm1191_vm2, 1.0, %v5767_v11 }
  0xc7   :  { %v2201_v26 = vsel %vm595_vm3, 1.0, %v5767_v11  ;;  %v2251_v5 = vsel %vm800_vm4, 1.0, %v5767_v11  ;;  %v5992_v15 = vfloor.f32 %v4293_v27  ;;  %vm596_vm7 = vcmp.eq.f32.partialorder %v4565_v12, 0.0  ;;  %v5994_v27 = vld [vmem:[#allocation47_spill] sm:$0xff] }
  0xc8   :  { %v1339_v33 = vadd.f32 %v2325_v59, %v1338_v55  ;;  %vm801_vm8 = vcmp.eq.f32.partialorder %v4565_v12, 1.0  ;;  %v1155_v39 = vadd.f32 %v2299_v47, %v1154_v56  ;;  %v2300_v58 = vsel %vm1007_vm5, 1.0, %v5767_v11 }
  0xc9   :  { %v4587_v32 = vmin.f32 %v5992_v15, 3.0  ;;  %v2327_v6 = vsel %vm1192_vm6, 1.0, %v5767_v11  ;;  %v744_v17 = vadd.f32 %v2201_v26, %v743_v38  ;;  %v949_v59 = vadd.f32 %v2251_v5, %v948_v53  ;;  %v5997_v15 = vld [vmem:[#allocation31_spill] sm:$0xff] }
  0xca   :  { %v1340_v43 = vadd.f32 %v2326_v34, %v1339_v33  ;;  %vm1008_vm9 = vcmp.eq.f32.partialorder %v4551_v18, 2.0  ;;  %vm1193_vm10 = vcmp.eq.f32.partialorder %v5994_v27, 3.0  ;;  %v5995_v55 = vfloor.f32 %v4322_v51 }
  0xcb   :  { %5993 = vst [vmem:[#allocation36_spill] sm:$0xff] %v4587_v32  ;;  %v2202_v47 = vsel %vm596_vm7, 1.0, %v5767_v11  ;;  %v2252_v42 = vsel %vm801_vm8, 1.0, %v5767_v11  ;;  %vm597_vm11 = vcmp.eq.f32.partialorder %v4587_v32, 0.0  ;;  %vm802_vm12 = vcmp.eq.f32.partialorder %v4587_v32, 1.0 }
  0xcc   :  { %v4601_v56 = vmin.f32 %v5995_v55, 3.0  ;;  %v1156_v38 = vadd.f32 %v2300_v58, %v1155_v39  ;;  %v1341_v53 = vadd.f32 %v2327_v6, %v1340_v43  ;;  %v2301_v5 = vsel %vm1008_vm9, 1.0, %v5767_v11  ;;  %v5999_v43 = vld [vmem:[#allocation32_spill] sm:$0xff] }
  0xcd   :  { %v2328_v51 = vsel %vm1193_vm10, 1.0, %v5767_v11  ;;  %v745_v33 = vadd.f32 %v2202_v47, %v744_v17  ;;  %v950_v55 = vadd.f32 %v2252_v42, %v949_v59  ;;  %vm1009_vm13 = vcmp.eq.f32.partialorder %v4565_v12, 2.0 }
  0xce   :  { %5996 = vst [vmem:[#allocation48_spill] sm:$0xff] %v4601_v56  ;;  %vm1194_vm14 = vcmp.eq.f32.partialorder %v5997_v15, 3.0  ;;  %v5998_v45 = vfloor.f32 %v4338_v19  ;;  %vm598_vm15 = vcmp.eq.f32.partialorder %v4601_v56, 0.0  ;;  %v2203_v39 = vsel %vm597_vm11, 1.0, %v5767_v11 }
  0xcf   :  { %v2253_v58 = vsel %vm802_vm12, 1.0, %v5767_v11  ;;  %vm803_vm0 = vcmp.eq.f32.partialorder %v4601_v56, 1.0  ;;  %v1157_v6 = vadd.f32 %v2301_v5, %v1156_v38  ;;  %vm1195_vm1 = vcmp.eq.f32.partialorder %v5999_v43, 3.0 }
  0xd0   :  { %v4615_v27 = vmin.f32 %v5998_v45, 3.0  ;;  %v1342_v42 = vadd.f32 %v2328_v51, %v1341_v53  ;;  %v6000_v59 = vfloor.f32 %v4341_v20  ;;  %v2302_v19 = vsel %vm1009_vm13, 1.0, %v5767_v11 }
  0xd1   :  { %v2329_v45 = vsel %vm1194_vm14, 1.0, %v5767_v11  ;;  %v746_v26 = vadd.f32 %v2203_v39, %v745_v33  ;;  %v951_v34 = vadd.f32 %v2253_v58, %v950_v55  ;;  %vm1010_vm2 = vcmp.eq.f32.partialorder %v4587_v32, 2.0 }
  0xd2   :  { %v4625_v47 = vmin.f32 %v6000_v59, 3.0  ;;  %vm1196_vm3 = vcmp.eq.f32.partialorder %v4241_v46, 3.0  ;;  %vm599_vm4 = vcmp.eq.f32.partialorder %v4615_v27, 0.0  ;;  %v2204_v38 = vsel %vm598_vm15, 1.0, %v5767_v11 }
  0xd3   :  { %v2254_v20 = vsel %vm803_vm0, 1.0, %v5767_v11  ;;  %v2330_v53 = vsel %vm1195_vm1, 1.0, %v5767_v11  ;;  %vm804_vm5 = vcmp.eq.f32.partialorder %v4615_v27, 1.0  ;;  %v1158_v5 = vadd.f32 %v2302_v19, %v1157_v6 }
  0xd4   :  { %vm1197_vm6 = vcmp.eq.f32.partialorder %v4264_v62, 3.0  ;;  %v1343_v51 = vadd.f32 %v2329_v45, %v1342_v42  ;;  %v6001_v33 = vfloor.f32 %v4355_v4  ;;  %vm1011_vm7 = vcmp.eq.f32.partialorder %v4601_v56, 2.0  ;;  %v6002_v45 = vld [vmem:[#allocation34_spill] sm:$0xff] }
  0xd5   :  { %v2303_v39 = vsel %vm1010_vm2, 1.0, %v5767_v11  ;;  %v2331_v58 = vsel %vm1196_vm3, 1.0, %v5767_v11  ;;  %v747_v59 = vadd.f32 %v2204_v38, %v746_v26  ;;  %v952_v17 = vadd.f32 %v2254_v20, %v951_v34 }
  0xd6   :  { %v4641_v55 = vmin.f32 %v6001_v33, 3.0  ;;  %vm1198_vm8 = vcmp.eq.f32.partialorder %v4288_v48, 3.0  ;;  %v1344_v46 = vadd.f32 %v2330_v53, %v1343_v51  ;;  %vm600_vm9 = vcmp.eq.f32.partialorder %v4625_v47, 0.0 }
  0xd7   :  { %v2205_v6 = vsel %vm599_vm4, 1.0, %v5767_v11  ;;  %v2255_v4 = vsel %vm804_vm5, 1.0, %v5767_v11  ;;  %v2332_v42 = vsel %vm1197_vm6, 1.0, %v5767_v11  ;;  %vm805_vm10 = vcmp.eq.f32.partialorder %v4625_v47, 1.0 }
  0xd8   :  { %v1159_v19 = vadd.f32 %v2303_v39, %v1158_v5  ;;  %vm1199_vm11 = vcmp.eq.f32.partialorder %v6002_v45, 3.0  ;;  %v1345_v26 = vadd.f32 %v2331_v58, %v1344_v46  ;;  %v6003_v34 = vfloor.f32 %v4358_v0 }
  0xd9   :  { %vm1012_vm12 = vcmp.eq.f32.partialorder %v4615_v27, 2.0  ;;  %v2304_v20 = vsel %vm1011_vm7, 1.0, %v5767_v11  ;;  %v2333_v53 = vsel %vm1198_vm8, 1.0, %v5767_v11  ;;  %v748_v51 = vadd.f32 %v2205_v6, %v747_v59 }
  0xda   :  { %v4657_v38 = vmin.f32 %v6003_v34, 3.0  ;;  %v953_v33 = vadd.f32 %v2255_v4, %v952_v17  ;;  %vm1200_vm13 = vcmp.eq.f32.partialorder %v4311_v22, 3.0  ;;  %v1346_v5 = vadd.f32 %v2332_v42, %v1345_v26 }
  0xdb   :  { %vm601_vm14 = vcmp.eq.f32.partialorder %v4641_v55, 0.0  ;;  %v2206_v46 = vsel %vm600_vm9, 1.0, %v5767_v11  ;;  %v2256_v0 = vsel %vm805_vm10, 1.0, %v5767_v11  ;;  %v2334_v39 = vsel %vm1199_vm11, 1.0, %v5767_v11 }
  0xdc   :  { %vm806_vm15 = vcmp.eq.f32.partialorder %v4641_v55, 1.0  ;;  %v1160_v58 = vadd.f32 %v2304_v20, %v1159_v19  ;;  %vm1201_vm0 = vcmp.eq.f32.partialorder %v4326_v61, 3.0  ;;  %v1347_v59 = vadd.f32 %v2333_v53, %v1346_v5 }
  0xdd   :  { %v6004_v17 = vfloor.f32 %v4372_v30  ;;  %vm1013_vm1 = vcmp.eq.f32.partialorder %v4625_v47, 2.0  ;;  %v2305_v4 = vsel %vm1012_vm12, 1.0, %v5767_v11  ;;  %v2335_v42 = vsel %vm1200_vm13, 1.0, %v5767_v11 }
  0xde   :  { %v749_v26 = vadd.f32 %v2206_v46, %v748_v51  ;;  %v954_v34 = vadd.f32 %v2256_v0, %v953_v33  ;;  %vm1202_vm2 = vcmp.eq.f32.partialorder %v4346_v36, 3.0  ;;  %v1348_v19 = vadd.f32 %v2334_v39, %v1347_v59 }
  0xdf   :  { %v4675_v6 = vmin.f32 %v6004_v17, 3.0  ;;  %vm602_vm3 = vcmp.eq.f32.partialorder %v4657_v38, 0.0  ;;  %v2207_v30 = vsel %vm601_vm14, 1.0, %v5767_v11  ;;  %v2257_v20 = vsel %vm806_vm15, 1.0, %v5767_v11 }
  0xe0   :  { %v2336_v53 = vsel %vm1201_vm0, 1.0, %v5767_v11  ;;  %vm807_vm4 = vcmp.eq.f32.partialorder %v4657_v38, 1.0  ;;  %v1161_v5 = vadd.f32 %v2305_v4, %v1160_v58  ;;  %vm1203_vm5 = vcmp.eq.f32.partialorder %v4363_v44, 3.0 }
  0xe1   :  { %v1349_v51 = vadd.f32 %v2335_v42, %v1348_v19  ;;  %v6005_v33 = vfloor.f32 %v4375_v49  ;;  %vm1014_vm6 = vcmp.eq.f32.partialorder %v4641_v55, 2.0  ;;  %v2306_v0 = vsel %vm1013_vm1, 1.0, %v5767_v11 }
  0xe2   :  { %v2337_v39 = vsel %vm1202_vm2, 1.0, %v5767_v11  ;;  %v750_v59 = vadd.f32 %v2207_v30, %v749_v26  ;;  %v955_v17 = vadd.f32 %v2257_v20, %v954_v34  ;;  %vm1204_vm7 = vcmp.eq.f32.partialorder %v4380_v8, 3.0 }
  0xe3   :  { %v4693_v46 = vmin.f32 %v6005_v33, 3.0  ;;  %v1350_v58 = vadd.f32 %v2336_v53, %v1349_v51  ;;  %vm603_vm8 = vcmp.eq.f32.partialorder %v4675_v6, 0.0  ;;  %v2208_v49 = vsel %vm602_vm3, 1.0, %v5767_v11 }
  0xe4   :  { %v2258_v4 = vsel %vm807_vm4, 1.0, %v5767_v11  ;;  %v2338_v42 = vsel %vm1203_vm5, 1.0, %v5767_v11  ;;  %vm808_vm9 = vcmp.eq.f32.partialorder %v4675_v6, 1.0  ;;  %v1162_v19 = vadd.f32 %v2306_v0, %v1161_v5 }
  0xe5   :  { %6006 = vst [vmem:[#allocation37_spill] sm:$0xff] %v4693_v46  ;;  %vm1205_vm10 = vcmp.eq.f32.partialorder %v4397_v60, 3.0  ;;  %v1351_v26 = vadd.f32 %v2337_v39, %v1350_v58  ;;  %v6007_v34 = vfloor.f32 %v4389_v10  ;;  %vm1015_vm11 = vcmp.eq.f32.partialorder %v4657_v38, 2.0 }
  0xe6   :  { %v2307_v20 = vsel %vm1014_vm6, 1.0, %v5767_v11  ;;  %v2339_v53 = vsel %vm1204_vm7, 1.0, %v5767_v11  ;;  %v751_v51 = vadd.f32 %v2208_v49, %v750_v59  ;;  %v956_v33 = vadd.f32 %v2258_v4, %v955_v17 }
  0xe7   :  { %v4711_v30 = vmin.f32 %v6007_v34, 3.0  ;;  %vm1206_vm12 = vcmp.eq.f32.partialorder %v4414_v54, 3.0  ;;  %v1352_v5 = vadd.f32 %v2338_v42, %v1351_v26  ;;  %vm604_vm13 = vcmp.eq.f32.partialorder %v4693_v46, 0.0 }
  0xe8   :  { %v2209_v10 = vsel %vm603_vm8, 1.0, %v5767_v11  ;;  %v2259_v0 = vsel %vm808_vm9, 1.0, %v5767_v11  ;;  %v2340_v39 = vsel %vm1205_vm10, 1.0, %v5767_v11  ;;  %vm809_vm14 = vcmp.eq.f32.partialorder %v4693_v46, 1.0 }
  0xe9   :  { %6008 = vst [vmem:[#allocation38_spill] sm:$0xff] %v4711_v30  ;;  %v1163_v58 = vadd.f32 %v2307_v20, %v1162_v19  ;;  %vm1207_vm15 = vcmp.eq.f32.partialorder %v4429_v50, 3.0  ;;  %v1353_v59 = vadd.f32 %v2339_v53, %v1352_v5  ;;  %v6009_v17 = vfloor.f32 %v4392_v3 }
  0xea   :  { %vm1016_vm0 = vcmp.eq.f32.partialorder %v4675_v6, 2.0  ;;  %v2308_v4 = vsel %vm1015_vm11, 1.0, %v5767_v11  ;;  %v2341_v42 = vsel %vm1206_vm12, 1.0, %v5767_v11  ;;  %v752_v26 = vadd.f32 %v2209_v10, %v751_v51 }
  0xeb   :  { %v4729_v49 = vmin.f32 %v6009_v17, 3.0  ;;  %v957_v34 = vadd.f32 %v2259_v0, %v956_v33  ;;  %vm1208_vm1 = vcmp.eq.f32.partialorder %v4442_v25, 3.0  ;;  %v1354_v19 = vadd.f32 %v2340_v39, %v1353_v59 }
  0xec   :  { %vm605_vm2 = vcmp.eq.f32.partialorder %v4711_v30, 0.0  ;;  %v2210_v3 = vsel %vm604_vm13, 1.0, %v5767_v11  ;;  %v2260_v20 = vsel %vm809_vm14, 1.0, %v5767_v11  ;;  %v2342_v53 = vsel %vm1207_vm15, 1.0, %v5767_v11 }
  0xed   :  { %6010 = vst [vmem:[#allocation39_spill] sm:$0xff] %v4729_v49  ;;  %vm810_vm3 = vcmp.eq.f32.partialorder %v4711_v30, 1.0  ;;  %v1164_v5 = vadd.f32 %v2308_v4, %v1163_v58  ;;  %vm1209_vm4 = vcmp.eq.f32.partialorder %v4455_v37, 3.0  ;;  %v1355_v51 = vadd.f32 %v2341_v42, %v1354_v19 }
  0xee   :  { %v6011_v33 = vfloor.f32 %v4406_v13  ;;  %vm1017_vm5 = vcmp.eq.f32.partialorder %v4693_v46, 2.0  ;;  %v2309_v0 = vsel %vm1016_vm0, 1.0, %v5767_v11  ;;  %v2343_v39 = vsel %vm1208_vm1, 1.0, %v5767_v11 }
  0xef   :  { %v753_v59 = vadd.f32 %v2210_v3, %v752_v26  ;;  %v958_v17 = vadd.f32 %v2260_v20, %v957_v34  ;;  %vm1210_vm6 = vcmp.eq.f32.partialorder %v4468_v16, 3.0  ;;  %v1356_v58 = vadd.f32 %v2342_v53, %v1355_v51 }
  0xf0   :  { %v4747_v10 = vmin.f32 %v6011_v33, 3.0  ;;  %vm606_vm7 = vcmp.eq.f32.partialorder %v4729_v49, 0.0  ;;  %v2211_v13 = vsel %vm605_vm2, 1.0, %v5767_v11  ;;  %v2261_v4 = vsel %vm810_vm3, 1.0, %v5767_v11 }
  0xf1   :  { %v2344_v42 = vsel %vm1209_vm4, 1.0, %v5767_v11  ;;  %vm811_vm8 = vcmp.eq.f32.partialorder %v4729_v49, 1.0  ;;  %v1165_v19 = vadd.f32 %v2309_v0, %v1164_v5  ;;  %vm1211_vm9 = vcmp.eq.f32.partialorder %v4481_v9, 3.0 }
  0xf2   :  { %6012 = vst [vmem:[#allocation40_spill] sm:$0xff] %v4747_v10  ;;  %v1357_v26 = vadd.f32 %v2343_v39, %v1356_v58  ;;  %v6013_v34 = vfloor.f32 %v4409_v41  ;;  %vm1018_vm10 = vcmp.eq.f32.partialorder %v4711_v30, 2.0  ;;  %v2310_v20 = vsel %vm1017_vm5, 1.0, %v5767_v11 }
  0xf3   :  { %v2345_v53 = vsel %vm1210_vm6, 1.0, %v5767_v11  ;;  %v754_v51 = vadd.f32 %v2211_v13, %v753_v59  ;;  %v959_v33 = vadd.f32 %v2261_v4, %v958_v17  ;;  %vm1212_vm11 = vcmp.eq.f32.partialorder %v4493_v29, 3.0 }
  0xf4   :  { %v4765_v3 = vmin.f32 %v6013_v34, 3.0  ;;  %v1358_v5 = vadd.f32 %v2344_v42, %v1357_v26  ;;  %vm607_vm12 = vcmp.eq.f32.partialorder %v4747_v10, 0.0  ;;  %v2212_v41 = vsel %vm606_vm7, 1.0, %v5767_v11 }
  0xf5   :  { %v2262_v0 = vsel %vm811_vm8, 1.0, %v5767_v11  ;;  %v2346_v39 = vsel %vm1211_vm9, 1.0, %v5767_v11  ;;  %vm812_vm13 = vcmp.eq.f32.partialorder %v4747_v10, 1.0  ;;  %v1166_v58 = vadd.f32 %v2310_v20, %v1165_v19 }
  0xf6   :  { %6014 = vst [vmem:[#allocation41_spill] sm:$0xff] %v4765_v3  ;;  %vm1213_vm14 = vcmp.eq.f32.partialorder %v4497_v63, 3.0  ;;  %v1359_v59 = vadd.f32 %v2345_v53, %v1358_v5  ;;  %v6015_v17 = vfloor.f32 %v4423_v28  ;;  %vm1019_vm15 = vcmp.eq.f32.partialorder %v4729_v49, 2.0 }
  0xf7   :  { %v2311_v4 = vsel %vm1018_vm10, 1.0, %v5767_v11  ;;  %v2347_v42 = vsel %vm1212_vm11, 1.0, %v5767_v11  ;;  %v755_v26 = vadd.f32 %v2212_v41, %v754_v51  ;;  %v960_v34 = vadd.f32 %v2262_v0, %v959_v33 }
  0xf8   :  { %v4783_v13 = vmin.f32 %v6015_v17, 3.0  ;;  %vm1214_vm0 = vcmp.eq.f32.partialorder %v4519_v35, 3.0  ;;  %v1360_v19 = vadd.f32 %v2346_v39, %v1359_v59  ;;  %vm608_vm1 = vcmp.eq.f32.partialorder %v4765_v3, 0.0 }
  0xf9   :  { %v2213_v28 = vsel %vm607_vm12, 1.0, %v5767_v11  ;;  %v2263_v20 = vsel %vm812_vm13, 1.0, %v5767_v11  ;;  %v2348_v53 = vsel %vm1213_vm14, 1.0, %v5767_v11  ;;  %vm813_vm2 = vcmp.eq.f32.partialorder %v4765_v3, 1.0 }
  0xfa   :  { %6016 = vst [vmem:[#allocation42_spill] sm:$0xff] %v4783_v13  ;;  %v1167_v5 = vadd.f32 %v2311_v4, %v1166_v58  ;;  %vm1215_vm3 = vcmp.eq.f32.partialorder %v4535_v24, 3.0  ;;  %v1361_v51 = vadd.f32 %v2347_v42, %v1360_v19  ;;  %vm1020_vm4 = vcmp.eq.f32.partialorder %v4747_v10, 2.0 }
  0xfb   :  { %v2312_v33 = vsel %vm1019_vm15, 1.0, %v5767_v11  ;;  %v2349_v41 = vsel %vm1214_vm0, 1.0, %v5767_v11  ;;  %v756_v0 = vadd.f32 %v2213_v28, %v755_v26  ;;  %v961_v39 = vadd.f32 %v2263_v20, %v960_v34 }
  0xfc   :  { %vm1216_vm5 = vcmp.eq.f32.partialorder %v4551_v18, 3.0  ;;  %v1362_v59 = vadd.f32 %v2348_v53, %v1361_v51  ;;  %vm609_vm6 = vcmp.eq.f32.partialorder %v4783_v13, 0.0  ;;  %v2214_v58 = vsel %vm608_vm1, 1.0, %v5767_v11 }
  0xfd   :  { %v2264_v17 = vsel %vm813_vm2, 1.0, %v5767_v11  ;;  %v2350_v4 = vsel %vm1215_vm3, 1.0, %v5767_v11  ;;  %vm814_vm7 = vcmp.eq.f32.partialorder %v4783_v13, 1.0  ;;  %v1168_v42 = vadd.f32 %v2312_v33, %v1167_v5 }
  0xfe   :  { %vm1217_vm8 = vcmp.eq.f32.partialorder %v4565_v12, 3.0  ;;  %v1363_v26 = vadd.f32 %v2349_v41, %v1362_v59  ;;  %vm1021_vm9 = vcmp.eq.f32.partialorder %v4765_v3, 2.0  ;;  %v2313_v34 = vsel %vm1020_vm4, 1.0, %v5767_v11 }
  0xff   :  { %v2351_v19 = vsel %vm1216_vm5, 1.0, %v5767_v11  ;;  %v757_v28 = vadd.f32 %v2214_v58, %v756_v0  ;;  %v962_v20 = vadd.f32 %v2264_v17, %v961_v39  ;;  %vm1218_vm10 = vcmp.eq.f32.partialorder %v4587_v32, 3.0 }
 0x100   :  { %v1364_v53 = vadd.f32 %v2350_v4, %v1363_v26  ;;  %v2215_v51 = vsel %vm609_vm6, 1.0, %v5767_v11  ;;  %v2265_v5 = vsel %vm814_vm7, 1.0, %v5767_v11  ;;  %v2352_v33 = vsel %vm1217_vm8, 1.0, %v5767_v11 }
 0x101   :  { %v1169_v41 = vadd.f32 %v2313_v34, %v1168_v42  ;;  %vm1219_vm11 = vcmp.eq.f32.partialorder %v4601_v56, 3.0  ;;  %vm1022_vm12 = vcmp.eq.f32.partialorder %v4783_v13, 2.0  ;;  %v2314_v12 = vsel %vm1021_vm9, 1.0, %v5767_v11 }
 0x102   :  { %v1365_v59 = vadd.f32 %v2351_v19, %v1364_v53  ;;  %v2353_v0 = vsel %vm1218_vm10, 1.0, %v5767_v11  ;;  %v758_v39 = vadd.f32 %v2215_v51, %v757_v28  ;;  %v963_v58 = vadd.f32 %v2265_v5, %v962_v20 }
 0x103   :  { %vm1220_vm13 = vcmp.eq.f32.partialorder %v4615_v27, 3.0  ;;  %v2354_v4 = vsel %vm1219_vm11, 1.0, %v5767_v11  ;;  %v1170_v26 = vadd.f32 %v2314_v12, %v1169_v41  ;;  %vm1221_vm14 = vcmp.eq.f32.partialorder %v4625_v47, 3.0 }
 0x104   :  { %v1366_v17 = vadd.f32 %v2352_v33, %v1365_v59  ;;  %v2315_v34 = vsel %vm1022_vm12, 1.0, %v5767_v11  ;;  %v2355_v19 = vsel %vm1220_vm13, 1.0, %v5767_v11  ;;  %v759_v53 = vrot.slane %v758_v39, 4 }
 0x105   :  { %v964_v56 = vrot.slane %v963_v58, 4  ;;  %vm1222_vm15 = vcmp.eq.f32.partialorder %v4641_v55, 3.0  ;;  %v2356_v28 = vsel %vm1221_vm14, 1.0, %v5767_v11  ;;  %v1171_v20 = vadd.f32 %v2315_v34, %v1170_v26 }
 0x106   :  { %v1367_v42 = vadd.f32 %v2353_v0, %v1366_v17  ;;  %vm1223_vm0 = vcmp.eq.f32.partialorder %v4657_v38, 3.0  ;;  %v2357_v12 = vsel %vm1222_vm15, 1.0, %v5767_v11  ;;  %v760_v5 = vadd.f32 %v759_v53, %v758_v39 }
 0x107   :  { %v965_v33 = vadd.f32 %v964_v56, %v963_v58  ;;  %vm1224_vm1 = vcmp.eq.f32.partialorder %v4675_v6, 3.0  ;;  %v2358_v59 = vsel %vm1223_vm0, 1.0, %v5767_v11  ;;  %v1172_v0 = vrot.slane %v1171_v20, 4 }
 0x108   :  { %v1368_v32 = vadd.f32 %v2354_v4, %v1367_v42  ;;  %vm1225_vm2 = vcmp.eq.f32.partialorder %v4693_v46, 3.0  ;;  %v2359_v4 = vsel %vm1224_vm1, 1.0, %v5767_v11  ;;  %v761_v42 = vrot.slane %v760_v5, 2 }
 0x109   :  { %v966_v26 = vrot.slane %v965_v33, 2  ;;  %vm1226_vm3 = vcmp.eq.f32.partialorder %v4711_v30, 3.0  ;;  %v2360_v34 = vsel %vm1225_vm2, 1.0, %v5767_v11  ;;  %v1173_v39 = vadd.f32 %v1172_v0, %v1171_v20 }
 0x10a   :  { %v1369_v51 = vadd.f32 %v2355_v19, %v1368_v32  ;;  %vm1227_vm4 = vcmp.eq.f32.partialorder %v4729_v49, 3.0  ;;  %v2361_v58 = vsel %vm1226_vm3, 1.0, %v5767_v11  ;;  %v762_v19 = vadd.f32 %v761_v42, %v760_v5 }
 0x10b   :  { %v967_v53 = vadd.f32 %v966_v26, %v965_v33  ;;  %vm1228_vm5 = vcmp.eq.f32.partialorder %v4747_v10, 3.0  ;;  %vm1229_vm6 = vcmp.eq.f32.partialorder %v4765_v3, 3.0  ;;  %vm1230_vm7 = vcmp.eq.f32.partialorder %v4783_v13, 3.0 }
 0x10c   :  { %v1370_v41 = vadd.f32 %v2356_v28, %v1369_v51  ;;  %v2362_v51 = vsel %vm1227_vm4, 1.0, %v5767_v11  ;;  %v2365_v42 = vsel %vm1230_vm7, 1.0, %v5767_v11 }
 0x10d   :  { %v968_v20 = vrot.slane %v967_v53, 1 }
 0x10e   :  { %v1371_v17 = vadd.f32 %v2357_v12, %v1370_v41  ;;  %v1174_v12 = vrot.slane %v1173_v39, 2 }
 0x110   :  { %v1372_v32 = vadd.f32 %v2358_v59, %v1371_v17  ;;  %v2363_v59 = vsel %vm1228_vm5, 1.0, %v5767_v11  ;;  %v763_v17 = vrot.slane %v762_v19, 1  ;;  %v1175_v5 = vadd.f32 %v1174_v12, %v1173_v39 }
 0x112   :  { %v1373_v56 = vadd.f32 %v2359_v4, %v1372_v32  ;;  %v2364_v4 = vsel %vm1229_vm6, 1.0, %v5767_v11  ;;  %v764_v26 = vadd.f32 %v763_v17, %v762_v19  ;;  %v969_v32 = vadd.f32 %v968_v20, %v967_v53 }
 0x114   :  { %v1374_v28 = vadd.f32 %v2360_v34, %v1373_v56  ;;  %v1176_v56 = vrot.slane %v1175_v5, 1  ;;  %vm970_vm8 = vcmp.gt.f32.partialorder %v969_v32, %v764_v26 }
 0x115   :  { %v972_v49 = vsel %vm970_vm8, %v969_v32, %v764_v26  ;;  %v971_v19 = vsel %vm970_vm8, 1.0, %v5767_v11  ;;  %v6027_v32 = vld [vmem:[#allocation33_spill] sm:$0xff] }
 0x116   :  { %v1375_v41 = vadd.f32 %v2361_v58, %v1374_v28  ;;  %v1177_v28 = vadd.f32 %v1176_v56, %v1175_v5 }
 0x118   :  { %v1376_v0 = vadd.f32 %v2362_v51, %v1375_v41  ;;  %vm1178_vm9 = vcmp.gt.f32.partialorder %v1177_v28, %v972_v49 }
 0x119   :  { %v1180_v41 = vsel %vm1178_vm9, %v1177_v28, %v972_v49  ;;  %v1179_v53 = vsel %vm1178_vm9, 2.0, %v971_v19 }
 0x11a   :  { %v1377_v33 = vadd.f32 %v2363_v59, %v1376_v0  ;;  %v6021_v59 = vld [vmem:[#allocation27_spill] sm:$0xff]  ;;  %v6024_v0 = vld [vmem:[#allocation46_spill] sm:$0xff] }
 0x11c   :  { %v1378_v34 = vadd.f32 %v2364_v4, %v1377_v33 }
 0x11e   :  { %v1379_v10 = vadd.f32 %v2365_v42, %v1378_v34  ;;  %v6026_v42 = vld [vmem:[#allocation47_spill] sm:$0xff]  ;;  %v6028_v34 = vld [vmem:[#allocation4_spill] sm:$0xff] }
 0x11f   :  { %v6029_v56 = vunpack.c.l.bf16 %v6028_v34  ;;  %v6030_v19 = vunpack.c.h.bf16 %v6028_v34 }
 0x120   :  { %v1380_v58 = vrot.slane %v1379_v10, 4 }
 0x122   :  { %v1381_v3 = vadd.f32 %v1380_v58, %v1379_v10 }
 0x124   :  { %v1382_v30 = vrot.slane %v1381_v3, 2 }
 0x126   :  { %v1383_v13 = vadd.f32 %v1382_v30, %v1381_v3 }
 0x128   :  { %v1384_v51 = vrot.slane %v1383_v13, 1 }
 0x12a   :  { %v1385_v46 = vadd.f32 %v1384_v51, %v1383_v13  ;;  %v3090_v51 = vld [vmem:[%s5652_s0 + $0xc8] sm:$0xff]  }
 0x12c   :  { %vm1386_vm10 = vcmp.gt.f32.partialorder %v1385_v46, %v1180_v41 }
 0x12d   :  { %v4850_v39 = vsel %vm1386_vm10, %v1385_v46, %v1180_v41  ;;  %v4853_v12 = vsel %vm1386_vm10, 3.0, %v1179_v53 }
 0x12e   :  { %6017 = vst [vmem:[#allocation43_spill] sm:$0xff] %v4850_v39  ;;  %vm1389_vm11 = vcmp.eq.f32.partialorder %v3999_v1, %v4853_v12  ;;  %vm1390_vm12 = vcmp.eq.f32.partialorder %v4001_v31, %v4853_v12  ;;  %vm1391_vm13 = vcmp.eq.f32.partialorder %v4028_v57, %v4853_v12  ;;  %vm1392_vm14 = vcmp.eq.f32.partialorder %v5987_v2, %v4853_v12  ;;  %v6018_v1 = vld [vmem:[#allocation2_spill] sm:$0xff]  ;;  %v6022_v2 = vld [vmem:[#allocation3_spill] sm:$0xff] }
 0x12f   :  { %v4862_v30 = vsel %vm1389_vm11, 1.0, %v5767_v11  ;;  %v4865_v46 = vsel %vm1390_vm12, 1.0, %v5767_v11  ;;  %v4870_v49 = vsel %vm1391_vm13, 1.0, %v5767_v11  ;;  %vm1393_vm15 = vcmp.eq.f32.partialorder %v4064_v14, %v4853_v12 }
 0x130   :  { %v6019_v31 = vunpack.c.l.bf16 %v6018_v1  ;;  %v6020_v57 = vunpack.c.h.bf16 %v6018_v1  ;;  %v4881_v13 = vsel %vm1392_vm14, 1.0, %v5767_v11  ;;  %vm1394_vm0 = vcmp.eq.f32.partialorder %v6021_v59, %v4853_v12 }
 0x131   :  { %vm1395_vm1 = vcmp.eq.f32.partialorder %v4093_v40, %v4853_v12  ;;  %v6023_v14 = vunpack.c.l.bf16 %v6022_v2  ;;  %vm1396_vm2 = vcmp.eq.f32.partialorder %v4108_v21, %v4853_v12  ;;  %vm1397_vm3 = vcmp.eq.f32.partialorder %v4127_v23, %v4853_v12 }
 0x132   :  { %v1541_v10 = vmul.f32 %v6019_v31, %v4862_v30  ;;  %v1542_v3 = vmul.f32 %v6020_v57, %v4865_v46  ;;  %vm1398_vm4 = vcmp.eq.f32.partialorder %v4142_v7, %v4853_v12  ;;  %v4897_v20 = vsel %vm1393_vm15, 1.0, %v5767_v11  ;;  %v3091_v31 = vld [vmem:[%s5652_s0 + $0xd0] sm:$0xff]  }
 0x133   :  { %v1543_v17 = vmul.f32 %v6023_v14, %v4870_v49  ;;  %vm1399_vm5 = vcmp.eq.f32.partialorder %v6024_v0, %v4853_v12  ;;  %vm1400_vm6 = vcmp.eq.f32.partialorder %v4157_v52, %v4853_v12  ;;  %v6025_v4 = vunpack.c.h.bf16 %v6022_v2 }
 0x134   :  { %v1591_v33 = vadd.f32 %v1542_v3, %v1541_v10  ;;  %vm1401_vm7 = vcmp.eq.f32.partialorder %v6026_v42, %v4853_v12  ;;  %vm1402_vm8 = vcmp.eq.f32.partialorder %v5997_v15, %v4853_v12  ;;  %vm1403_vm9 = vcmp.eq.f32.partialorder %v5999_v43, %v4853_v12  ;;  %v6031_v3 = vld [vmem:[#allocation5_spill] sm:$0xff] }
 0x135   :  { %v1544_v5 = vmul.f32 %v6025_v4, %v4881_v13  ;;  %v4913_v26 = vsel %vm1394_vm0, 1.0, %v5767_v11  ;;  %vm1404_vm10 = vcmp.eq.f32.partialorder %v6027_v32, %v4853_v12  ;;  %vm1405_vm11 = vcmp.eq.f32.partialorder %v4264_v62, %v4853_v12 }
 0x136   :  { %v1545_v58 = vmul.f32 %v6029_v56, %v4897_v20  ;;  %v1592_v28 = vadd.f32 %v1591_v33, %v1543_v17  ;;  %vm1406_vm12 = vcmp.eq.f32.partialorder %v4288_v48, %v4853_v12  ;;  %vm1407_vm13 = vcmp.eq.f32.partialorder %v6002_v45, %v4853_v12  ;;  %v3092_v56 = vld [vmem:[%s5652_s0 + $0xd8] sm:$0xff]  }
 0x137   :  { %v4935_v41 = vsel %vm1395_vm1, 1.0, %v5767_v11  ;;  %vm1409_vm15 = vcmp.eq.f32.partialorder %v4326_v61, %v4853_v12  ;;  %v1546_v53 = vmul.f32 %v6030_v19, %v4913_v26  ;;  %v4953_v40 = vsel %vm1396_vm2, 1.0, %v5767_v11  ;;  %v6034_v19 = vld [vmem:[#allocation6_spill] sm:$0xff] }
 0x138   :  { %v1593_v1 = vadd.f32 %v1592_v28, %v1544_v5  ;;  %v2818_v10 = vunpack.c.l.bf16 %v3090_v51  ;;  %v2819_v57 = vunpack.c.h.bf16 %v3090_v51  ;;  %vm1412_vm1 = vcmp.eq.f32.partialorder %v4380_v8, %v4853_v12 }
 0x139   :  { %v6032_v59 = vunpack.c.l.bf16 %v6031_v3  ;;  %vm1414_vm14 = vcmp.eq.f32.partialorder %v4414_v54, %v4853_v12  ;;  %vm1415_vm2 = vcmp.eq.f32.partialorder %v4429_v50, %v4853_v12  ;;  %v4970_v21 = vsel %vm1397_vm3, 1.0, %v5767_v11 }
 0x13a   :  { %v1594_v14 = vadd.f32 %v1593_v1, %v1545_v58  ;;  %v2822_v17 = vunpack.c.l.bf16 %v3091_v31  ;;  %vm1416_vm0 = vcmp.eq.f32.partialorder %v4442_v25, %v4853_v12  ;;  %v4978_v4 = vsel %vm1398_vm4, 1.0, %v5767_v11 }
 0x13b   :  { %v1547_v2 = vmul.f32 %v6032_v59, %v4935_v41  ;;  %v4984_v5 = vsel %vm1399_vm5, 1.0, %v5767_v11  ;;  %v6033_v23 = vunpack.c.h.bf16 %v6031_v3  ;;  %vm1417_vm3 = vcmp.eq.f32.partialorder %v4455_v37, %v4853_v12 }
 0x13c   :  { %v1595_v34 = vadd.f32 %v1594_v14, %v1546_v53  ;;  %vm1418_vm4 = vcmp.eq.f32.partialorder %v4468_v16, %v4853_v12  ;;  %v5000_v7 = vsel %vm1400_vm6, 1.0, %v5767_v11  ;;  %v2823_v0 = vunpack.c.h.bf16 %v3091_v31  ;;  %v3093_v14 = vld [vmem:[%s5652_s0 + $0xe0] sm:$0xff]  }
 0x13d   :  { %v1548_v33 = vmul.f32 %v6033_v23, %v4953_v40  ;;  %v1748_v58 = vmul.f32 %v2818_v10, %v4862_v30  ;;  %v1749_v28 = vmul.f32 %v2819_v57, %v4865_v46  ;;  %v5010_v51 = vsel %vm1401_vm7, 1.0, %v5767_v11 }
 0x13e   :  { %v5016_v52 = vsel %vm1402_vm8, 1.0, %v5767_v11  ;;  %v6035_v53 = vunpack.c.l.bf16 %v6034_v19  ;;  %v1596_v31 = vadd.f32 %v1595_v34, %v1547_v2  ;;  %vm1420_vm6 = vcmp.eq.f32.partialorder %v4493_v29, %v4853_v12 }
 0x13f   :  { %vm1421_vm5 = vcmp.eq.f32.partialorder %v4497_v63, %v4853_v12  ;;  %v5029_v42 = vsel %vm1403_vm9, 1.0, %v5767_v11  ;;  %v5035_v15 = vsel %vm1404_vm10, 1.0, %v5767_v11  ;;  %v2826_v10 = vunpack.c.l.bf16 %v3092_v56 }
 0x140   :  { %v1549_v1 = vmul.f32 %v6035_v53, %v4970_v21  ;;  %v1750_v57 = vmul.f32 %v2822_v17, %v4870_v49  ;;  %vm1422_vm7 = vcmp.eq.f32.partialorder %v4519_v35, %v4853_v12  ;;  %v5044_v3 = vsel %vm1405_vm11, 1.0, %v5767_v11  ;;  %v6042_v53 = vld [vmem:[#allocation48_spill] sm:$0xff] }
 0x141   :  { %v5050_v43 = vsel %vm1406_vm12, 1.0, %v5767_v11  ;;  %v6036_v32 = vunpack.c.h.bf16 %v6034_v19  ;;  %v1597_v2 = vadd.f32 %v1596_v31, %v1548_v33  ;;  %vm1423_vm8 = vcmp.eq.f32.partialorder %v4535_v24, %v4853_v12  ;;  %v6037_v33 = vld [vmem:[#allocation35_spill] sm:$0xff] }
 0x142   :  { %vm1424_vm9 = vcmp.eq.f32.partialorder %v4551_v18, %v4853_v12  ;;  %v5066_v62 = vsel %vm1407_vm13, 1.0, %v5767_v11  ;;  %v2827_v48 = vunpack.c.h.bf16 %v3092_v56  ;;  %v1751_v17 = vmul.f32 %v2823_v0, %v4881_v13  ;;  %v6039_v56 = vld [vmem:[#allocation7_spill] sm:$0xff] }
 0x143   :  { %v1550_v59 = vmul.f32 %v6036_v32, %v4978_v4  ;;  %v1798_v23 = vadd.f32 %v1749_v28, %v1748_v58  ;;  %vm1425_vm10 = vcmp.eq.f32.partialorder %v6037_v33, %v4853_v12  ;;  %vm6038_vm11 = vcmp.eq.f32.partialorder %v4311_v22, %v4853_v12  ;;  %v6041_v28 = vld [vmem:[#allocation36_spill] sm:$0xff]  ;;  %v6066_v33 = vld [vmem:[#allocation10_spill] sm:$0xff] }
 0x144   :  { %v5075_v34 = vsel %vm6038_vm11, 1.0, %v5767_v11  ;;  %v5081_v45 = vsel %vm1409_vm15, 1.0, %v5767_v11  ;;  %v6040_v19 = vunpack.c.l.bf16 %v6039_v56  ;;  %v1598_v58 = vadd.f32 %v1597_v2, %v1549_v1 }
 0x145   :  { %vm1427_vm13 = vcmp.eq.f32.partialorder %v6042_v53, %v4853_v12  ;;  %vm6043_vm11 = vcmp.eq.f32.partialorder %v4346_v36, %v4853_v12  ;;  %v2830_v61 = vunpack.c.l.bf16 %v3093_v14  ;;  %v1752_v31 = vmul.f32 %v2826_v10, %v4897_v20 }
 0x146   :  { %v1551_v0 = vmul.f32 %v6040_v19, %v4984_v5  ;;  %v5094_v22 = vsel %vm6043_vm11, 1.0, %v5767_v11  ;;  %v1799_v32 = vadd.f32 %v1798_v23, %v1750_v57  ;;  %vm6044_vm12 = vcmp.eq.f32.partialorder %v4363_v44, %v4853_v12  ;;  %v3094_v23 = vld [vmem:[%s5652_s0 + $0xe8] sm:$0xff]  }
 0x147   :  { %v5103_v1 = vsel %vm6044_vm12, 1.0, %v5767_v11  ;;  %v5109_v36 = vsel %vm1412_vm1, 1.0, %v5767_v11  ;;  %v6045_v2 = vunpack.c.h.bf16 %v6039_v56  ;;  %v1599_v57 = vadd.f32 %v1598_v58, %v1550_v59 }
 0x148   :  { %vm1429_vm11 = vcmp.eq.f32.partialorder %v4625_v47, %v4853_v12  ;;  %vm1430_vm12 = vcmp.eq.f32.partialorder %v4641_v55, %v4853_v12  ;;  %vm6046_vm1 = vcmp.eq.f32.partialorder %v4397_v60, %v4853_v12  ;;  %v2831_v8 = vunpack.c.h.bf16 %v3093_v14  ;;  %v6048_v14 = vld [vmem:[#allocation8_spill] sm:$0xff] }
 0x149   :  { %v1552_v10 = vmul.f32 %v6045_v2, %v5000_v7  ;;  %v5125_v44 = vsel %vm6046_vm1, 1.0, %v5767_v11  ;;  %v1753_v56 = vmul.f32 %v2827_v48, %v4913_v26  ;;  %v1800_v59 = vadd.f32 %v1799_v32, %v1751_v17  ;;  %v6050_v32 = vld [vmem:[#allocation37_spill] sm:$0xff] }
 0x14a   :  { %v5134_v19 = vsel %vm1414_vm14, 1.0, %v5767_v11  ;;  %v5140_v60 = vsel %vm1415_vm2, 1.0, %v5767_v11  ;;  %v6049_v58 = vunpack.c.l.bf16 %v6048_v14  ;;  %v1600_v17 = vadd.f32 %v1599_v57, %v1551_v0 }
 0x14b   :  { %6047 = vst [vmem:[#allocation44_spill] sm:$0xff] %v5140_v60  ;;  %vm1432_vm1 = vcmp.eq.f32.partialorder %v4675_v6, %v4853_v12  ;;  %vm1433_vm15 = vcmp.eq.f32.partialorder %v6050_v32, %v4853_v12  ;;  %v5153_v54 = vsel %vm1416_vm0, 1.0, %v5767_v11  ;;  %v2834_v50 = vunpack.c.l.bf16 %v3094_v23  ;;  %v6051_v60 = vld [vmem:[#allocation38_spill] sm:$0xff] }
 0x14c   :  { %v1553_v48 = vmul.f32 %v6049_v58, %v5010_v51  ;;  %v1754_v2 = vmul.f32 %v2830_v61, %v4935_v41  ;;  %v1801_v39 = vadd.f32 %v1800_v59, %v1752_v31  ;;  %vm1434_vm14 = vcmp.eq.f32.partialorder %v6051_v60, %v4853_v12  ;;  %v3095_v59 = vld [vmem:[%s5652_s0 + $0xf0] sm:$0xff]   ;;  %v6055_v58 = vld [vmem:[#allocation39_spill] sm:$0xff] }
 0x14d   :  { %v5162_v0 = vsel %vm1417_vm3, 1.0, %v5767_v11  ;;  %v5168_v25 = vsel %vm1418_vm4, 1.0, %v5767_v11  ;;  %v6054_v57 = vunpack.c.h.bf16 %v6048_v14  ;;  %v1601_v31 = vadd.f32 %v1600_v17, %v1552_v10  ;;  %v3098_v60 = vld [vmem:[%s5652_s0 + $0x108] sm:$0xff]  }
 0x14e   :  { %6052 = vst [vmem:[#allocation45_spill] sm:$0xff] %v5162_v0  ;;  %vm1435_vm0 = vcmp.eq.f32.partialorder %v6055_v58, %v4853_v12  ;;  %vm6056_vm2 = vcmp.eq.f32.partialorder %v4481_v9, %v4853_v12  ;;  %v2835_v16 = vunpack.c.h.bf16 %v3094_v23  ;;  %v1802_v0 = vadd.f32 %v1801_v39, %v1753_v56  ;;  %v6058_v9 = vld [vmem:[#allocation9_spill] sm:$0xff] }
 0x14f   :  { %6053 = vst [vmem:[#allocation28_spill] sm:$0xff] %v5168_v25  ;;  %v1554_v61 = vmul.f32 %v6054_v57, %v5016_v52  ;;  %v5182_v37 = vsel %vm6056_vm2, 1.0, %v5767_v11  ;;  %v1755_v25 = vmul.f32 %v2831_v8, %v4953_v40  ;;  %v5189_v10 = vsel %vm1420_vm6, 1.0, %v5767_v11  ;;  %v6060_v8 = vld [vmem:[#allocation40_spill] sm:$0xff]  ;;  %v6061_v39 = vld [vmem:[#allocation41_spill] sm:$0xff] }
 0x150   :  { %v5195_v14 = vsel %vm1421_vm5, 1.0, %v5767_v11  ;;  %v6059_v17 = vunpack.c.l.bf16 %v6058_v9  ;;  %v1602_v23 = vadd.f32 %v1601_v31, %v1553_v48  ;;  %vm1436_vm3 = vcmp.eq.f32.partialorder %v6060_v8, %v4853_v12 }
 0x151   :  { %6057 = vst [vmem:[#allocation29_spill] sm:$0xff] %v5195_v14  ;;  %vm1437_vm4 = vcmp.eq.f32.partialorder %v6061_v39, %v4853_v12  ;;  %v5208_v29 = vsel %vm1422_vm7, 1.0, %v5767_v11  ;;  %v2838_v63 = vunpack.c.l.bf16 %v3095_v59  ;;  %v1756_v56 = vmul.f32 %v2834_v50, %v4970_v21  ;;  %v3096_v50 = vld [vmem:[%s5652_s0 + $0xf8] sm:$0xff]  }
 0x152   :  { %v1555_v57 = vmul.f32 %v6059_v17, %v5029_v42  ;;  %6062 = vst [vmem:[#allocation30_spill] sm:$0xff] %v5208_v29  ;;  %v1803_v14 = vadd.f32 %v1802_v0, %v1754_v2  ;;  %v5215_v48 = vsel %vm1423_vm8, 1.0, %v5767_v11  ;;  %v5221_v31 = vsel %vm1424_vm9, 1.0, %v5767_v11 }
 0x153   :  { %v6063_v35 = vunpack.c.h.bf16 %v6058_v9  ;;  %v1603_v29 = vadd.f32 %v1602_v23, %v1554_v61  ;;  %v5233_v24 = vsel %vm1425_vm10, 1.0, %v5767_v11  ;;  %v2839_v2 = vunpack.c.h.bf16 %v3095_v59 }
 0x154   :  { %v1757_v18 = vmul.f32 %v2835_v16, %v4978_v4  ;;  %v1804_v0 = vadd.f32 %v1803_v14, %v1755_v25  ;;  %vm6064_vm5 = vcmp.eq.f32.partialorder %v6041_v28, %v4853_v12  ;;  %v5246_v61 = vsel %vm1427_vm13, 1.0, %v5767_v11  ;;  %v6068_v16 = vld [vmem:[#allocation42_spill] sm:$0xff] }
 0x155   :  { %v1556_v17 = vmul.f32 %v6063_v35, %v5035_v15  ;;  %v5240_v9 = vsel %vm6064_vm5, 1.0, %v5767_v11  ;;  %6065 = vst [vmem:[#allocation49_spill] sm:$0xff] %v5246_v61  ;;  %v6067_v23 = vunpack.c.l.bf16 %v6066_v33  ;;  %v1604_v59 = vadd.f32 %v1603_v29, %v1555_v57 }
 0x156   :  { %vm1438_vm6 = vcmp.eq.f32.partialorder %v6068_v16, %v4853_v12  ;;  %vm6069_vm7 = vcmp.eq.f32.partialorder %v4615_v27, %v4853_v12  ;;  %v2842_v25 = vunpack.c.l.bf16 %v3096_v50  ;;  %v1758_v14 = vmul.f32 %v2838_v63, %v4984_v5  ;;  %v3097_v63 = vld [vmem:[%s5652_s0 + $0x100] sm:$0xff]  }
 0x157   :  { %v1557_v35 = vmul.f32 %v6067_v23, %v5044_v3  ;;  %v5257_v28 = vsel %vm6069_vm7, 1.0, %v5767_v11  ;;  %v1805_v53 = vadd.f32 %v1804_v0, %v1756_v56  ;;  %v5264_v61 = vsel %vm1429_vm11, 1.0, %v5767_v11 }
 0x158   :  { %6070 = vst [vmem:[#allocation31_spill] sm:$0xff] %v5264_v61  ;;  %v5270_v57 = vsel %vm1430_vm12, 1.0, %v5767_v11  ;;  %v6072_v27 = vunpack.c.h.bf16 %v6066_v33  ;;  %v1605_v23 = vadd.f32 %v1604_v59, %v1556_v17  ;;  %vm6073_vm8 = vcmp.eq.f32.partialorder %v4657_v38, %v4853_v12  ;;  %v6077_v38 = vld [vmem:[#allocation11_spill] sm:$0xff] }
 0x159   :  { %6071 = vst [vmem:[#allocation32_spill] sm:$0xff] %v5270_v57  ;;  %v5282_v47 = vsel %vm6073_vm8, 1.0, %v5767_v11  ;;  %v2843_v56 = vunpack.c.h.bf16 %v3096_v50  ;;  %v1759_v55 = vmul.f32 %v2839_v2, %v5000_v7  ;;  %v1806_v0 = vadd.f32 %v1805_v53, %v1757_v18  ;;  %v3115_v2 = vld [vmem:[%s5652_s0 + $0x190] sm:$0xff]  }
 0x15a   :  { %v1558_v29 = vmul.f32 %v6072_v27, %v5050_v43  ;;  %6074 = vst [vmem:[#allocation34_spill] sm:$0xff] %v5282_v47  ;;  %v5289_v33 = vsel %vm1432_vm1, 1.0, %v5767_v11  ;;  %v5295_v17 = vsel %vm1433_vm15, 1.0, %v5767_v11  ;;  %v6078_v59 = vunpack.c.l.bf16 %v6077_v38 }
 0x15b   :  { %6075 = vst [vmem:[#allocation2_spill] sm:$0xff] %v5289_v33  ;;  %v1606_v50 = vadd.f32 %v1605_v23, %v1557_v35  ;;  %v5307_v6 = vsel %vm1434_vm14, 1.0, %v5767_v11  ;;  %v2846_v18 = vunpack.c.l.bf16 %v3097_v63  ;;  %v1760_v32 = vmul.f32 %v2842_v25, %v5010_v51  ;;  %v3116_v25 = vld [vmem:[%s5652_s0 + $0x198] sm:$0xff]  }
 0x15c   :  { %6076 = vst [vmem:[#allocation27_spill] sm:$0xff] %v5295_v17  ;;  %v1559_v27 = vmul.f32 %v6078_v59, %v5066_v62  ;;  %v1807_v53 = vadd.f32 %v1806_v0, %v1758_v14  ;;  %v5314_v59 = vsel %vm1435_vm0, 1.0, %v5767_v11  ;;  %v6081_v35 = vunpack.c.h.bf16 %v6077_v38 }
 0x15d   :  { %6079 = vst [vmem:[#allocation3_spill] sm:$0xff] %v5307_v6  ;;  %v1607_v17 = vadd.f32 %v1606_v50, %v1558_v29  ;;  %v2847_v33 = vunpack.c.h.bf16 %v3097_v63  ;;  %v1761_v14 = vmul.f32 %v2843_v56, %v5016_v52  ;;  %v2918_v58 = vunpack.c.l.bf16 %v3115_v2  ;;  %v6085_v63 = vld [vmem:[#allocation12_spill] sm:$0xff] }
 0x15e   :  { %6080 = vst [vmem:[#allocation46_spill] sm:$0xff] %v5314_v59  ;;  %v1560_v23 = vmul.f32 %v6081_v35, %v5075_v34  ;;  %v1808_v0 = vadd.f32 %v1807_v53, %v1759_v55  ;;  %v2919_v11 = vunpack.c.h.bf16 %v3115_v2  ;;  %v6082_v59 = vmov 0.0   ;;  %v3099_v2 = vld [vmem:[%s5652_s0 + $0x110] sm:$0xff]  }
 0x15f   :  { %v5330_v38 = vsel %vm1436_vm3, 1.0, %v6082_v59  ;;  %v5336_v29 = vsel %vm1437_vm4, 1.0, %v6082_v59  ;;  %v6086_v50 = vunpack.c.l.bf16 %v6085_v63  ;;  %v1608_v56 = vadd.f32 %v1607_v17, %v1559_v27  ;;  %v3117_v17 = vld [vmem:[%s5652_s0 + $0x1a0] sm:$0xff]  }
 0x160   :  { %6083 = vst [vmem:[#allocation47_spill] sm:$0xff] %v5330_v38  ;;  %v2850_v55 = vunpack.c.l.bf16 %v3098_v60  ;;  %v1762_v8 = vmul.f32 %v2846_v18, %v5029_v42  ;;  %v1809_v53 = vadd.f32 %v1808_v0, %v1760_v32  ;;  %v2922_v38 = vunpack.c.l.bf16 %v3116_v25 }
 0x161   :  { %6084 = vst [vmem:[#allocation33_spill] sm:$0xff] %v5336_v29  ;;  %v1561_v35 = vmul.f32 %v6086_v50, %v5081_v45  ;;  %v6087_v6 = vunpack.c.h.bf16 %v6085_v63  ;;  %v1609_v47 = vadd.f32 %v1608_v56, %v1560_v23  ;;  %v2851_v29 = vunpack.c.h.bf16 %v3098_v60 }
 0x162   :  { %v1763_v57 = vmul.f32 %v2847_v33, %v5035_v15  ;;  %v1810_v27 = vadd.f32 %v1809_v53, %v1761_v14  ;;  %v2923_v50 = vunpack.c.h.bf16 %v3116_v25  ;;  %v1955_v61 = vmul.f32 %v2918_v58, %v4862_v30  ;;  %v3100_v25 = vld [vmem:[%s5652_s0 + $0x118] sm:$0xff]   ;;  %v6091_v53 = vld [vmem:[#allocation14_spill] sm:$0xff] }
 0x163   :  { %v1562_v39 = vmul.f32 %v6087_v6, %v5094_v22  ;;  %v1956_v18 = vmul.f32 %v2919_v11, %v4865_v46  ;;  %v5358_v32 = vsel %vm1438_vm6, 1.0, %v6082_v59  ;;  %v6088_v6 = vld [vmem:[#allocation13_spill] sm:$0xff]  ;;  %v1610_v60 = vadd.f32 %v1609_v47, %v1561_v35  ;;  %v3118_v47 = vld [vmem:[%s5652_s0 + $0x1a8] sm:$0xff]  }
 0x164   :  { %v6089_v23 = vunpack.c.l.bf16 %v6088_v6  ;;  %v2854_v0 = vunpack.c.l.bf16 %v3099_v2  ;;  %v1764_v30 = vmul.f32 %v2850_v55, %v5044_v3  ;;  %v1811_v14 = vadd.f32 %v1810_v27, %v1762_v8 }
 0x165   :  { %v2926_v11 = vunpack.c.l.bf16 %v3117_v17  ;;  %v1957_v46 = vmul.f32 %v2922_v38, %v4870_v49  ;;  %v6090_v12 = vunpack.c.h.bf16 %v6088_v6  ;;  %v1611_v59 = vadd.f32 %v1610_v60, %v1562_v39  ;;  %v3119_v60 = vld [vmem:[%s5652_s0 + $0x1b0] sm:$0xff]  }
 0x166   :  { %v1563_v33 = vmul.f32 %v6089_v23, %v5103_v1  ;;  %v2855_v58 = vunpack.c.h.bf16 %v3099_v2  ;;  %v1765_v63 = vmul.f32 %v2851_v29, %v5050_v43  ;;  %v1812_v35 = vadd.f32 %v1811_v14, %v1763_v57  ;;  %v3101_v29 = vld [vmem:[%s5652_s0 + $0x120] sm:$0xff]  }
 0x167   :  { %v1564_v16 = vmul.f32 %v6090_v12, %v5109_v36  ;;  %v2927_v56 = vunpack.c.h.bf16 %v3117_v17  ;;  %v1958_v55 = vmul.f32 %v2923_v50, %v4881_v13  ;;  %v2005_v8 = vadd.f32 %v1956_v18, %v1955_v61 }
 0x168   :  { %v6092_v49 = vunpack.c.l.bf16 %v6091_v53  ;;  %v1612_v27 = vadd.f32 %v1611_v59, %v1563_v33  ;;  %v2858_v6 = vunpack.c.l.bf16 %v3100_v25  ;;  %v1766_v39 = vmul.f32 %v2854_v0, %v5066_v62  ;;  %v6094_v59 = vld [vmem:[#allocation44_spill] sm:$0xff] }
 0x169   :  { %v1813_v2 = vadd.f32 %v1812_v35, %v1764_v30  ;;  %v2930_v23 = vunpack.c.l.bf16 %v3118_v47  ;;  %v1959_v57 = vmul.f32 %v2926_v11, %v4897_v20  ;;  %v2006_v17 = vadd.f32 %v2005_v8, %v1957_v46  ;;  %v6095_v20 = vld [vmem:[#allocation15_spill] sm:$0xff] }
 0x16a   :  { %v1565_v38 = vmul.f32 %v6092_v49, %v5125_v44  ;;  %v6093_v13 = vunpack.c.h.bf16 %v6091_v53  ;;  %v1613_v50 = vadd.f32 %v1612_v27, %v1564_v16  ;;  %v2859_v18 = vunpack.c.h.bf16 %v3100_v25  ;;  %v3102_v25 = vld [vmem:[%s5652_s0 + $0x128] sm:$0xff]   ;;  %v3120_v27 = vld [vmem:[%s5652_s0 + $0x1b8] sm:$0xff]  }
 0x16b   :  { %v1767_v33 = vmul.f32 %v2855_v58, %v5075_v34  ;;  %v1814_v0 = vadd.f32 %v1813_v2, %v1765_v63  ;;  %v2931_v14 = vunpack.c.h.bf16 %v3118_v47  ;;  %v1960_v30 = vmul.f32 %v2927_v56, %v4913_v26 }
 0x16c   :  { %v1566_v61 = vmul.f32 %v6093_v13, %v5134_v19  ;;  %v2007_v12 = vadd.f32 %v2006_v17, %v1958_v55  ;;  %v6096_v11 = vunpack.c.l.bf16 %v6095_v20  ;;  %v1614_v35 = vadd.f32 %v1613_v50, %v1565_v38  ;;  %v6098_v13 = vld [vmem:[#allocation45_spill] sm:$0xff] }
 0x16d   :  { %v2862_v8 = vunpack.c.l.bf16 %v3101_v29  ;;  %v1768_v16 = vmul.f32 %v2858_v6, %v5081_v45  ;;  %v1815_v58 = vadd.f32 %v1814_v0, %v1766_v39  ;;  %v2934_v53 = vunpack.c.l.bf16 %v3119_v60 }
 0x16e   :  { %v1567_v46 = vmul.f32 %v6096_v11, %v6094_v59  ;;  %v1961_v63 = vmul.f32 %v2930_v23, %v4935_v41  ;;  %v2008_v47 = vadd.f32 %v2007_v12, %v1959_v57  ;;  %v6097_v26 = vunpack.c.h.bf16 %v6095_v20  ;;  %v6099_v41 = vld [vmem:[#allocation16_spill] sm:$0xff] }
 0x16f   :  { %v1615_v55 = vadd.f32 %v1614_v35, %v1566_v61  ;;  %v2863_v49 = vunpack.c.h.bf16 %v3101_v29  ;;  %v1769_v38 = vmul.f32 %v2859_v18, %v5094_v22  ;;  %v1816_v6 = vadd.f32 %v1815_v58, %v1767_v33  ;;  %v3103_v29 = vld [vmem:[%s5652_s0 + $0x130] sm:$0xff]   ;;  %v3121_v33 = vld [vmem:[%s5652_s0 + $0x1c0] sm:$0xff]  }
 0x170   :  { %v1568_v56 = vmul.f32 %v6097_v26, %v5153_v54  ;;  %v2935_v2 = vunpack.c.h.bf16 %v3119_v60  ;;  %v1962_v39 = vmul.f32 %v2931_v14, %v4953_v40  ;;  %v2009_v17 = vadd.f32 %v2008_v47, %v1960_v30  ;;  %v6101_v14 = vld [vmem:[#allocation28_spill] sm:$0xff]  ;;  %v6103_v26 = vld [vmem:[#allocation17_spill] sm:$0xff] }
 0x171   :  { %v6100_v23 = vunpack.c.l.bf16 %v6099_v41  ;;  %v1616_v50 = vadd.f32 %v1615_v55, %v1567_v46  ;;  %v2866_v0 = vunpack.c.l.bf16 %v3102_v25  ;;  %v1770_v61 = vmul.f32 %v2862_v8, %v5103_v1 }
 0x172   :  { %v1817_v18 = vadd.f32 %v1816_v6, %v1768_v16  ;;  %v2938_v12 = vunpack.c.l.bf16 %v3120_v27  ;;  %v1963_v40 = vmul.f32 %v2934_v53, %v4970_v21  ;;  %v2010_v60 = vadd.f32 %v2009_v17, %v1961_v63  ;;  %v3104_v63 = vld [vmem:[%s5652_s0 + $0x138] sm:$0xff]  }
 0x173   :  { %v1569_v57 = vmul.f32 %v6100_v23, %v6098_v13  ;;  %v6102_v30 = vunpack.c.h.bf16 %v6099_v41  ;;  %v1617_v11 = vadd.f32 %v1616_v50, %v1568_v56  ;;  %v2867_v46 = vunpack.c.h.bf16 %v3102_v25 }
 0x174   :  { %v1771_v35 = vmul.f32 %v2863_v49, %v5109_v36  ;;  %v1818_v8 = vadd.f32 %v1817_v18, %v1769_v38  ;;  %v2939_v58 = vunpack.c.h.bf16 %v3120_v27  ;;  %v1964_v16 = vmul.f32 %v2935_v2, %v4978_v4  ;;  %v3122_v49 = vld [vmem:[%s5652_s0 + $0x1c8] sm:$0xff]   ;;  %v6106_v18 = vld [vmem:[#allocation29_spill] sm:$0xff] }
 0x175   :  { %v1570_v20 = vmul.f32 %v6102_v30, %v6101_v14  ;;  %v2011_v47 = vadd.f32 %v2010_v60, %v1962_v39  ;;  %v6104_v55 = vunpack.c.l.bf16 %v6103_v26  ;;  %v1618_v23 = vadd.f32 %v1617_v11, %v1569_v57  ;;  %v6107_v60 = vld [vmem:[#allocation18_spill] sm:$0xff] }
 0x176   :  { %v2870_v21 = vunpack.c.l.bf16 %v3103_v29  ;;  %v2942_v53 = vunpack.c.l.bf16 %v3121_v33  ;;  %v1772_v25 = vmul.f32 %v2866_v0, %v5125_v44  ;;  %v1819_v56 = vadd.f32 %v1818_v8, %v1770_v61 }
 0x177   :  { %v1571_v6 = vmul.f32 %v6104_v55, %v5182_v37  ;;  %v1965_v4 = vmul.f32 %v2938_v12, %v4984_v5  ;;  %v2012_v38 = vadd.f32 %v2011_v47, %v1963_v40  ;;  %v6105_v27 = vunpack.c.h.bf16 %v6103_v26  ;;  %v3105_v40 = vld [vmem:[%s5652_s0 + $0x140] sm:$0xff]  }
 0x178   :  { %v1619_v39 = vadd.f32 %v1618_v23, %v1570_v20  ;;  %v2871_v17 = vunpack.c.h.bf16 %v3103_v29  ;;  %v2943_v41 = vunpack.c.h.bf16 %v3121_v33  ;;  %v1773_v57 = vmul.f32 %v2867_v46, %v5134_v19  ;;  %v3123_v20 = vld [vmem:[%s5652_s0 + $0x1d0] sm:$0xff]  }
 0x179   :  { %v1572_v2 = vmul.f32 %v6105_v27, %v5189_v10  ;;  %v1820_v50 = vadd.f32 %v1819_v56, %v1771_v35  ;;  %v1966_v0 = vmul.f32 %v2939_v58, %v5000_v7  ;;  %v2013_v61 = vadd.f32 %v2012_v38, %v1964_v16  ;;  %v6109_v35 = vld [vmem:[#allocation30_spill] sm:$0xff]  ;;  %v6111_v56 = vld [vmem:[#allocation19_spill] sm:$0xff] }
 0x17a   :  { %v6108_v30 = vunpack.c.l.bf16 %v6107_v60  ;;  %v1620_v8 = vadd.f32 %v1619_v39, %v1571_v6  ;;  %v2874_v5 = vunpack.c.l.bf16 %v3104_v63  ;;  %v2946_v12 = vunpack.c.l.bf16 %v3122_v49 }
 0x17b   :  { %v1774_v29 = vmul.f32 %v2870_v21, %v6094_v59  ;;  %v1821_v33 = vadd.f32 %v1820_v50, %v1772_v25  ;;  %v1967_v7 = vmul.f32 %v2942_v53, %v5010_v51  ;;  %v2014_v46 = vadd.f32 %v2013_v61, %v1965_v4  ;;  %v3106_v4 = vld [vmem:[%s5652_s0 + $0x148] sm:$0xff]  }
 0x17c   :  { %v1573_v11 = vmul.f32 %v6108_v30, %v6106_v18  ;;  %v6110_v58 = vunpack.c.h.bf16 %v6107_v60  ;;  %v1621_v47 = vadd.f32 %v1620_v8, %v1572_v2  ;;  %v2875_v26 = vunpack.c.h.bf16 %v3104_v63  ;;  %v3124_v2 = vld [vmem:[%s5652_s0 + $0x1d8] sm:$0xff]  }
 0x17d   :  { %v2947_v55 = vunpack.c.h.bf16 %v3122_v49  ;;  %v1775_v6 = vmul.f32 %v2871_v17, %v5153_v54  ;;  %v1822_v23 = vadd.f32 %v1821_v33, %v1773_v57  ;;  %v1968_v21 = vmul.f32 %v2943_v41, %v5016_v52 }
 0x17e   :  { %v1574_v16 = vmul.f32 %v6110_v58, %v6109_v35  ;;  %v2015_v25 = vadd.f32 %v2014_v46, %v1966_v0  ;;  %v6112_v38 = vunpack.c.l.bf16 %v6111_v56  ;;  %v1622_v39 = vadd.f32 %v1621_v47, %v1573_v11  ;;  %v3125_v58 = vld [vmem:[%s5652_s0 + $0x1e0] sm:$0xff]  }
 0x17f   :  { %v2878_v51 = vunpack.c.l.bf16 %v3105_v40  ;;  %v2950_v53 = vunpack.c.l.bf16 %v3123_v20  ;;  %v1776_v63 = vmul.f32 %v2874_v5, %v6098_v13  ;;  %v1823_v49 = vadd.f32 %v1822_v23, %v1774_v29  ;;  %v6114_v5 = vld [vmem:[#allocation20_spill] sm:$0xff] }
 0x180   :  { %v1575_v27 = vmul.f32 %v6112_v38, %v5215_v48  ;;  %v1969_v52 = vmul.f32 %v2946_v12, %v5029_v42  ;;  %v2016_v17 = vadd.f32 %v2015_v25, %v1967_v7  ;;  %v6113_v41 = vunpack.c.h.bf16 %v6111_v56  ;;  %v3107_v7 = vld [vmem:[%s5652_s0 + $0x150] sm:$0xff]  }
 0x181   :  { %v1623_v50 = vadd.f32 %v1622_v39, %v1574_v16  ;;  %v2879_v0 = vunpack.c.h.bf16 %v3105_v40  ;;  %v2951_v61 = vunpack.c.h.bf16 %v3123_v20  ;;  %v1777_v60 = vmul.f32 %v2875_v26, %v6101_v14  ;;  %v6118_v39 = vld [vmem:[#allocation21_spill] sm:$0xff] }
 0x182   :  { %v1576_v57 = vmul.f32 %v6113_v41, %v5221_v31  ;;  %v1824_v30 = vadd.f32 %v1823_v49, %v1775_v6  ;;  %v1970_v11 = vmul.f32 %v2947_v55, %v5035_v15  ;;  %v2017_v8 = vadd.f32 %v2016_v17, %v1968_v21 }
 0x183   :  { %v6115_v29 = vunpack.c.l.bf16 %v6114_v5  ;;  %v1624_v46 = vadd.f32 %v1623_v50, %v1575_v27  ;;  %v2882_v42 = vunpack.c.l.bf16 %v3106_v4  ;;  %v2954_v12 = vunpack.c.l.bf16 %v3124_v2  ;;  %v6117_v27 = vld [vmem:[#allocation49_spill] sm:$0xff] }
 0x184   :  { %v1778_v40 = vmul.f32 %v2878_v51, %v5182_v37  ;;  %v1825_v20 = vadd.f32 %v1824_v30, %v1776_v63  ;;  %v1971_v15 = vmul.f32 %v2950_v53, %v5044_v3  ;;  %v2018_v16 = vadd.f32 %v2017_v8, %v1969_v52 }
 0x185   :  { %v1577_v33 = vmul.f32 %v6115_v29, %v5233_v24  ;;  %v6116_v47 = vunpack.c.h.bf16 %v6114_v5  ;;  %v1625_v55 = vadd.f32 %v1624_v46, %v1576_v57  ;;  %v2883_v6 = vunpack.c.h.bf16 %v3106_v4  ;;  %v3126_v4 = vld [vmem:[%s5652_s0 + $0x1e8] sm:$0xff]  }
 0x186   :  { %v2955_v23 = vunpack.c.h.bf16 %v3124_v2  ;;  %v1779_v21 = vmul.f32 %v2879_v0, %v5189_v10  ;;  %v1826_v25 = vadd.f32 %v1825_v20, %v1777_v60  ;;  %v1972_v56 = vmul.f32 %v2951_v61, %v5050_v43  ;;  %v3108_v61 = vld [vmem:[%s5652_s0 + $0x158] sm:$0xff]   ;;  %v6121_v29 = vld [vmem:[#allocation31_spill] sm:$0xff] }
 0x187   :  { %v1578_v26 = vmul.f32 %v6116_v47, %v5240_v9  ;;  %v2019_v38 = vadd.f32 %v2018_v16, %v1970_v11  ;;  %v6119_v51 = vunpack.c.l.bf16 %v6118_v39  ;;  %v1626_v49 = vadd.f32 %v1625_v55, %v1577_v33  ;;  %v6124_v47 = vld [vmem:[#allocation32_spill] sm:$0xff] }
 0x188   :  { %v2886_v3 = vunpack.c.l.bf16 %v3107_v7  ;;  %v2958_v53 = vunpack.c.l.bf16 %v3125_v58  ;;  %v1780_v52 = vmul.f32 %v2882_v42, %v6106_v18  ;;  %v1827_v17 = vadd.f32 %v1826_v25, %v1778_v40 }
 0x189   :  { %v1579_v63 = vmul.f32 %v6119_v51, %v6117_v27  ;;  %v1973_v2 = vmul.f32 %v2954_v12, %v5066_v62  ;;  %v2020_v41 = vadd.f32 %v2019_v38, %v1971_v15  ;;  %v6120_v43 = vunpack.c.h.bf16 %v6118_v39  ;;  %v6122_v62 = vld [vmem:[#allocation22_spill] sm:$0xff]  ;;  %v6127_v51 = vld [vmem:[#allocation23_spill] sm:$0xff] }
 0x18a   :  { %v1627_v50 = vadd.f32 %v1626_v49, %v1578_v26  ;;  %v2887_v0 = vunpack.c.h.bf16 %v3107_v7  ;;  %v2959_v60 = vunpack.c.h.bf16 %v3125_v58  ;;  %v1781_v30 = vmul.f32 %v2883_v6, %v6109_v35  ;;  %v3127_v58 = vld [vmem:[%s5652_s0 + $0x1f0] sm:$0xff]   ;;  %v3109_v6 = vld [vmem:[%s5652_s0 + $0x160] sm:$0xff]  }
 0x18b   :  { %v1580_v57 = vmul.f32 %v6120_v43, %v5257_v28  ;;  %v1828_v11 = vadd.f32 %v1827_v17, %v1779_v21  ;;  %v1974_v8 = vmul.f32 %v2955_v23, %v5075_v34  ;;  %v2021_v5 = vadd.f32 %v2020_v41, %v1972_v56  ;;  %v6126_v39 = vld [vmem:[#allocation34_spill] sm:$0xff] }
 0x18c   :  { %v6123_v33 = vunpack.c.l.bf16 %v6122_v62  ;;  %v1628_v42 = vadd.f32 %v1627_v50, %v1579_v63  ;;  %v2962_v12 = vunpack.c.l.bf16 %v3126_v4  ;;  %v1975_v40 = vmul.f32 %v2958_v53, %v5081_v45  ;;  %v6129_v43 = vld [vmem:[#allocation2_spill] sm:$0xff] }
 0x18d   :  { %v2890_v7 = vunpack.c.l.bf16 %v3108_v61  ;;  %v1782_v20 = vmul.f32 %v2886_v3, %v5215_v48  ;;  %v1829_v15 = vadd.f32 %v1828_v11, %v1780_v52  ;;  %v2022_v16 = vadd.f32 %v2021_v5, %v1973_v2 }
 0x18e   :  { %v1581_v46 = vmul.f32 %v6123_v33, %v6121_v29  ;;  %v6125_v34 = vunpack.c.h.bf16 %v6122_v62  ;;  %v1629_v55 = vadd.f32 %v1628_v42, %v1580_v57  ;;  %v2963_v23 = vunpack.c.h.bf16 %v3126_v4  ;;  %v6131_v62 = vld [vmem:[#allocation27_spill] sm:$0xff]  ;;  %v6132_v33 = vld [vmem:[#allocation24_spill] sm:$0xff] }
 0x18f   :  { %v1976_v45 = vmul.f32 %v2959_v60, %v5094_v22  ;;  %v2891_v21 = vunpack.c.h.bf16 %v3108_v61  ;;  %v1783_v25 = vmul.f32 %v2887_v0, %v5221_v31  ;;  %v1830_v56 = vadd.f32 %v1829_v15, %v1781_v30  ;;  %v3128_v22 = vld [vmem:[%s5652_s0 + $0x1f8] sm:$0xff]   ;;  %v3110_v61 = vld [vmem:[%s5652_s0 + $0x168] sm:$0xff]  }
 0x190   :  { %v1582_v26 = vmul.f32 %v6125_v34, %v6124_v47  ;;  %v2023_v38 = vadd.f32 %v2022_v16, %v1974_v8  ;;  %v6128_v63 = vunpack.c.l.bf16 %v6127_v51  ;;  %v1630_v3 = vadd.f32 %v1629_v55, %v1581_v46  ;;  %v6134_v34 = vld [vmem:[#allocation3_spill] sm:$0xff] }
 0x191   :  { %v2966_v53 = vunpack.c.l.bf16 %v3127_v58  ;;  %v1977_v52 = vmul.f32 %v2962_v12, %v5103_v1  ;;  %v2894_v17 = vunpack.c.l.bf16 %v3109_v6  ;;  %v1784_v2 = vmul.f32 %v2890_v7, %v5233_v24 }
 0x192   :  { %v1583_v49 = vmul.f32 %v6128_v63, %v6126_v39  ;;  %v1831_v41 = vadd.f32 %v1830_v56, %v1782_v20  ;;  %v2024_v4 = vadd.f32 %v2023_v38, %v1975_v40  ;;  %v6130_v57 = vunpack.c.h.bf16 %v6127_v51  ;;  %v6136_v51 = vld [vmem:[#allocation46_spill] sm:$0xff]  ;;  %v6137_v63 = vld [vmem:[#allocation25_spill] sm:$0xff] }
 0x193   :  { %v1631_v0 = vadd.f32 %v1630_v3, %v1582_v26  ;;  %v2967_v60 = vunpack.c.h.bf16 %v3127_v58  ;;  %v1978_v1 = vmul.f32 %v2963_v23, %v5109_v36  ;;  %v2895_v30 = vunpack.c.h.bf16 %v3109_v6  ;;  %v3129_v36 = vld [vmem:[%s5652_s0 + $0x200] sm:$0xff]   ;;  %v3111_v23 = vld [vmem:[%s5652_s0 + $0x170] sm:$0xff]  }
 0x194   :  { %v1584_v50 = vmul.f32 %v6130_v57, %v6129_v43  ;;  %v1785_v11 = vmul.f32 %v2891_v21, %v5240_v9  ;;  %v1832_v8 = vadd.f32 %v1831_v41, %v1783_v25  ;;  %v2025_v5 = vadd.f32 %v2024_v4, %v1976_v45  ;;  %v6139_v57 = vld [vmem:[#allocation47_spill] sm:$0xff] }
 0x195   :  { %v6133_v46 = vunpack.c.l.bf16 %v6132_v33  ;;  %v1632_v12 = vadd.f32 %v1631_v0, %v1583_v49  ;;  %v2970_v40 = vunpack.c.l.bf16 %v3128_v22  ;;  %v1979_v7 = vmul.f32 %v2966_v53, %v5125_v44 }
 0x196   :  { %v2898_v20 = vunpack.c.l.bf16 %v3110_v61  ;;  %v1786_v15 = vmul.f32 %v2894_v17, %v6117_v27  ;;  %v1833_v16 = vadd.f32 %v1832_v8, %v1784_v2  ;;  %v2026_v58 = vadd.f32 %v2025_v5, %v1977_v52 }
 0x197   :  { %v1585_v42 = vmul.f32 %v6133_v46, %v6131_v62  ;;  %v6135_v26 = vunpack.c.h.bf16 %v6132_v33  ;;  %v1633_v6 = vadd.f32 %v1632_v12, %v1584_v50  ;;  %v2971_v45 = vunpack.c.h.bf16 %v3128_v22  ;;  %v6141_v33 = vld [vmem:[#allocation33_spill] sm:$0xff]  ;;  %v6142_v46 = vld [vmem:[#allocation26_spill] sm:$0xff] }
 0x198   :  { %v1980_v44 = vmul.f32 %v2967_v60, %v5134_v19  ;;  %v2899_v21 = vunpack.c.h.bf16 %v3110_v61  ;;  %v1787_v25 = vmul.f32 %v2895_v30, %v5257_v28  ;;  %v1834_v56 = vadd.f32 %v1833_v16, %v1785_v11  ;;  %v3130_v19 = vld [vmem:[%s5652_s0 + $0x208] sm:$0xff]   ;;  %v3112_v60 = vld [vmem:[%s5652_s0 + $0x178] sm:$0xff]  }
 0x199   :  { %v1586_v55 = vmul.f32 %v6135_v26, %v6134_v34  ;;  %v2027_v38 = vadd.f32 %v2026_v58, %v1978_v1  ;;  %v6138_v49 = vunpack.c.l.bf16 %v6137_v63  ;;  %v1634_v53 = vadd.f32 %v1633_v6, %v1585_v42 }
 0x19a   :  { %v2974_v52 = vunpack.c.l.bf16 %v3129_v36  ;;  %v1981_v17 = vmul.f32 %v2970_v40, %v6094_v59  ;;  %v2902_v2 = vunpack.c.l.bf16 %v3111_v23  ;;  %v1788_v41 = vmul.f32 %v2898_v20, %v6121_v29 }
 0x19b   :  { %v1587_v3 = vmul.f32 %v6138_v49, %v6136_v51  ;;  %v1835_v4 = vadd.f32 %v1834_v56, %v1786_v15  ;;  %v2028_v22 = vadd.f32 %v2027_v38, %v1979_v7  ;;  %v6140_v50 = vunpack.c.h.bf16 %v6137_v63 }
 0x19c   :  { %v1635_v61 = vadd.f32 %v1634_v53, %v1586_v55  ;;  %v2975_v1 = vunpack.c.h.bf16 %v3129_v36  ;;  %v1982_v59 = vmul.f32 %v2971_v45, %v5153_v54  ;;  %v2903_v30 = vunpack.c.h.bf16 %v3111_v23  ;;  %v3131_v54 = vld [vmem:[%s5652_s0 + $0x210] sm:$0xff]   ;;  %v3113_v23 = vld [vmem:[%s5652_s0 + $0x180] sm:$0xff]  }
 0x19d   :  { %v1588_v0 = vmul.f32 %v6140_v50, %v6139_v57  ;;  %v1789_v11 = vmul.f32 %v2899_v21, %v6124_v47  ;;  %v1836_v8 = vadd.f32 %v1835_v4, %v1787_v25  ;;  %v2029_v5 = vadd.f32 %v2028_v22, %v1980_v44 }
 0x19e   :  { %v6143_v42 = vunpack.c.l.bf16 %v6142_v46  ;;  %v1636_v40 = vadd.f32 %v1635_v61, %v1587_v3  ;;  %v2978_v7 = vunpack.c.l.bf16 %v3130_v19  ;;  %v1983_v20 = vmul.f32 %v2974_v52, %v6098_v13 }
 0x19f   :  { %v2906_v15 = vunpack.c.l.bf16 %v3112_v60  ;;  %v1790_v16 = vmul.f32 %v2902_v2, %v6126_v39  ;;  %v1837_v58 = vadd.f32 %v1836_v8, %v1788_v41  ;;  %v2030_v36 = vadd.f32 %v2029_v5, %v1981_v17  ;;  %v3132_v17 = vld [vmem:[%s5652_s0 + $0x218] sm:$0xff]   ;;  %v6145_v41 = vld [vmem:[#allocation43_spill] sm:$0xff] }
 0x1a0   :  { %v1589_v12 = vmul.f32 %v6143_v42, %v6141_v33  ;;  %v6144_v26 = vunpack.c.h.bf16 %v6142_v46  ;;  %v1637_v6 = vadd.f32 %v1636_v40, %v1588_v0  ;;  %v2979_v45 = vunpack.c.h.bf16 %v3130_v19  ;;  %v3114_v19 = vld [vmem:[%s5652_s0 + $0x188] sm:$0xff]   ;;  %v3133_v46 = vld [vmem:[%s5652_s0 + $0x220] sm:$0xff]  }
 0x1a1   :  { %v1984_v13 = vmul.f32 %v2975_v1, %v6101_v14  ;;  %v2907_v44 = vunpack.c.h.bf16 %v3112_v60  ;;  %v1791_v21 = vmul.f32 %v2903_v30, %v6129_v43  ;;  %v1838_v25 = vadd.f32 %v1837_v58, %v1789_v11 }
 0x1a2   :  { %v1590_v55 = vmul.f32 %v6144_v26, %v5358_v32  ;;  %v2031_v56 = vadd.f32 %v2030_v36, %v1982_v59  ;;  %v1638_v38 = vadd.f32 %v1637_v6, %v1589_v12  ;;  %v2982_v63 = vunpack.c.l.bf16 %v3131_v54 }
 0x1a3   :  { %v1985_v49 = vmul.f32 %v2978_v7, %v5182_v37  ;;  %v2910_v3 = vunpack.c.l.bf16 %v3113_v23  ;;  %v1792_v53 = vmul.f32 %v2906_v15, %v6131_v62  ;;  %v1839_v52 = vadd.f32 %v1838_v25, %v1790_v16 }
 0x1a4   :  { %v2032_v2 = vadd.f32 %v2031_v56, %v1983_v20  ;;  %v1539_v14 = vmax.f32 %v6145_v41, 1.0  ;;  %v1639_v4 = vadd.f32 %v1638_v38, %v1590_v55  ;;  %v2983_v22 = vunpack.c.h.bf16 %v3131_v54 }
 0x1a5   :  { %v1986_v50 = vmul.f32 %v2979_v45, %v5189_v10  ;;  %v2911_v37 = vunpack.c.h.bf16 %v3113_v23  ;;  %v1793_v0 = vmul.f32 %v2907_v44, %v6134_v34  ;;  %v1840_v61 = vadd.f32 %v1839_v52, %v1791_v21  ;;  %v3134_v45 = vld [vmem:[%s5652_s0 + $0x228] sm:$0xff]  }
 0x1a6   :  { %v2033_v60 = vadd.f32 %v2032_v2, %v1984_v13  ;;  %v1640_v1 = vrot.slane %v1639_v4, 4  ;;  %v2986_v59 = vunpack.c.l.bf16 %v3132_v17  ;;  %v1987_v30 = vmul.f32 %v2982_v63, %v6106_v18 }
 0x1a7   :  { %v2914_v11 = vunpack.c.l.bf16 %v3114_v19  ;;  %v1794_v8 = vmul.f32 %v2910_v3, %v6136_v51  ;;  %v1841_v5 = vadd.f32 %v1840_v61, %v1792_v53  ;;  %3141 = vrcp.f32 %v1539_v14  ;;  %v3135_v53 = vld [vmem:[%s5652_s0 + $0x230] sm:$0xff]  }
 0x1a8   :  { %v2034_v42 = vadd.f32 %v2033_v60, %v1985_v49  ;;  %v1641_v10 = vadd.f32 %v1640_v1, %v1639_v4  ;;  %v2987_v12 = vunpack.c.h.bf16 %v3132_v17  ;;  %v1988_v40 = vmul.f32 %v2983_v22, %v6109_v35 }
 0x1a9   :  { %v2915_v7 = vunpack.c.h.bf16 %v3114_v19  ;;  %v1795_v20 = vmul.f32 %v2911_v37, %v6139_v57  ;;  %v1842_v15 = vadd.f32 %v1841_v5, %v1793_v0  ;;  %v2990_v58 = vunpack.c.l.bf16 %v3133_v46 }
 0x1aa   :  { %v2035_v16 = vadd.f32 %v2034_v42, %v1986_v50  ;;  %v1642_v18 = vrot.slane %v1641_v10, 2  ;;  %v1796_v54 = vmul.f32 %v2914_v11, %v6141_v33  ;;  %v1989_v26 = vmul.f32 %v2986_v59, %v5215_v48 }
 0x1ab   :  { %v1843_v36 = vadd.f32 %v1842_v15, %v1794_v8  ;;  %v2991_v23 = vunpack.c.h.bf16 %v3133_v46  ;;  %v1797_v35 = vmul.f32 %v2915_v7, %v5358_v32  ;;  %v1990_v44 = vmul.f32 %v2987_v12, %v5221_v31  ;;  %v3138_v12 = vld [vmem:[%s5652_s0 + $0x248] sm:$0xff]  }
 0x1ac   :  { %v2036_v55 = vadd.f32 %v2035_v16, %v1987_v30  ;;  %v1643_v6 = vadd.f32 %v1642_v18, %v1641_v10  ;;  %v2994_v63 = vunpack.c.l.bf16 %v3134_v45  ;;  %v1991_v48 = vmul.f32 %v2990_v58, %v5233_v24  ;;  %v3136_v24 = vld [vmem:[%s5652_s0 + $0x238] sm:$0xff]  }
 0x1ad   :  { %v1844_v13 = vadd.f32 %v1843_v36, %v1795_v20  ;;  %v5609_v25 = vpop.eup %3141  ;;  %v2995_v17 = vunpack.c.h.bf16 %v3134_v45  ;;  %v1992_v2 = vmul.f32 %v2991_v23, %v5240_v9  ;;  %v2998_v4 = vunpack.c.l.bf16 %v3135_v53 }
 0x1ae   :  { %v2037_v21 = vadd.f32 %v2036_v55, %v1988_v40  ;;  %v1644_v56 = vrot.slane %v1643_v6, 1  ;;  %v1993_v19 = vmul.f32 %v2994_v63, %v6117_v27  ;;  %v2999_v37 = vunpack.c.h.bf16 %v3135_v53  ;;  %v3137_v27 = vld [vmem:[%s5652_s0 + $0x240] sm:$0xff]  }
 0x1af   :  { %v1845_v38 = vadd.f32 %v1844_v13, %v1796_v54  ;;  %v1994_v9 = vmul.f32 %v2995_v17, %v5257_v28  ;;  %v3002_v60 = vunpack.c.l.bf16 %v3136_v24  ;;  %v1995_v1 = vmul.f32 %v2998_v4, %v6121_v29 }
 0x1b0   :  { %v2038_v49 = vadd.f32 %v2037_v21, %v1989_v26  ;;  %v1645_v3 = vadd.f32 %v1644_v56, %v1643_v6  ;;  %v3003_v11 = vunpack.c.h.bf16 %v3136_v24  ;;  %v1996_v8 = vmul.f32 %v2999_v37, %v6124_v47 }
 0x1b1   :  { %v1846_v52 = vadd.f32 %v1845_v38, %v1797_v35  ;;  %v3006_v42 = vunpack.c.l.bf16 %v3137_v27  ;;  %v1997_v10 = vmul.f32 %v3002_v60, %v6126_v39  ;;  %v3007_v40 = vunpack.c.h.bf16 %v3137_v27  ;;  %v3139_v39 = vld [vmem:[%s5652_s0 + $0x250] sm:$0xff]  }
 0x1b2   :  { %v2039_v41 = vadd.f32 %v2038_v49, %v1990_v44  ;;  %v1646_v31 = vmul.f32 %v5609_v25, %v1645_v3  ;;  %v1998_v7 = vmul.f32 %v3003_v11, %v6129_v43  ;;  %v3010_v16 = vunpack.c.l.bf16 %v3138_v12 }
 0x1b3   :  { %v1847_v14 = vrot.slane %v1846_v52, 4  ;;  %v1999_v47 = vmul.f32 %v3006_v42, %v6131_v62  ;;  %v3011_v58 = vunpack.c.h.bf16 %v3138_v12  ;;  %v2000_v54 = vmul.f32 %v3007_v40, %v6134_v34 }
 0x1b4   :  { %v2040_v22 = vadd.f32 %v2039_v41, %v1991_v48  ;;  %1647 = vst [vmem:[%s5653_s1] sm:$0x1] %v1646_v31  ;;  %v3014_v43 = vunpack.c.l.bf16 %v3139_v39  ;;  %v2001_v26 = vmul.f32 %v3010_v16, %v6136_v51  ;;  %v3015_v6 = vunpack.c.h.bf16 %v3139_v39 }
 0x1b5   :  { %v1848_v50 = vadd.f32 %v1847_v14, %v1846_v52  ;;  %v2002_v62 = vmul.f32 %v3011_v58, %v6139_v57 }
 0x1b6   :  { %v2041_v0 = vadd.f32 %v2040_v22, %v1992_v2  ;;  %v2003_v45 = vmul.f32 %v3014_v43, %v6141_v33  ;;  %v2004_v13 = vmul.f32 %v3015_v6, %v5358_v32 }
 0x1b7   :  { %v1849_v61 = vrot.slane %v1848_v50, 2 }
 0x1b8   :  { %v2042_v59 = vadd.f32 %v2041_v0, %v1993_v19 }
 0x1b9   :  { %v1850_v30 = vadd.f32 %v1849_v61, %v1848_v50 }
 0x1ba   :  { %v2043_v5 = vadd.f32 %v2042_v59, %v1994_v9 }
 0x1bb   :  { %v1851_v46 = vrot.slane %v1850_v30, 1 }
 0x1bc   :  { %v2044_v28 = vadd.f32 %v2043_v5, %v1995_v1 }
 0x1bd   :  { %v1852_v29 = vadd.f32 %v1851_v46, %v1850_v30 }
 0x1be   :  { %v2045_v20 = vadd.f32 %v2044_v28, %v1996_v8 }
 0x1bf   :  { %v1853_v15 = vmul.f32 %v5609_v25, %v1852_v29 }
 0x1c0   :  { %v2046_v18 = vadd.f32 %v2045_v20, %v1997_v10 }
 0x1c1   :  { %1854 = vst [vmem:[%s5653_s1 + $0x1] sm:$0x1] %v1853_v15 }
 0x1c2   :  { %v2047_v36 = vadd.f32 %v2046_v18, %v1998_v7 }
 0x1c4   :  { %v2048_v55 = vadd.f32 %v2047_v36, %v1999_v47 }
 0x1c6   :  { %v2049_v23 = vadd.f32 %v2048_v55, %v2000_v54 }
 0x1c8   :  { %v2050_v35 = vadd.f32 %v2049_v23, %v2001_v26 }
 0x1ca   :  { %v2051_v44 = vadd.f32 %v2050_v35, %v2002_v62 }
 0x1cc   :  { %v2052_v21 = vadd.f32 %v2051_v44, %v2003_v45 }
 0x1ce   :  { %v2053_v56 = vadd.f32 %v2052_v21, %v2004_v13 }
 0x1d0   :  { %v2054_v38 = vrot.slane %v2053_v56, 4 }
 0x1d2   :  { %v2055_v63 = vadd.f32 %v2054_v38, %v2053_v56 }
 0x1d4   :  { %v2056_v34 = vrot.slane %v2055_v63, 2 }
 0x1d6   :  { %v2057_v48 = vadd.f32 %v2056_v34, %v2055_v63 }
 0x1d8   :  { %v2058_v49 = vrot.slane %v2057_v48, 1 }
 0x1da   :  { %v2059_v3 = vadd.f32 %v2058_v49, %v2057_v48 }
 0x1dc   :  { %v2060_v51 = vmul.f32 %v5609_v25, %v2059_v3 }
 0x1de   :  { %2061 = vst [vmem:[%s5653_s1 + $0x2] sm:$0x1] %v2060_v51 }

</bundles_post_ra>
